<compile_context>
chip_gen: v5e
topology: v5e:2x2
jax: 0.10.0
libtpu: 0.0.40
codegen_flags: <defaults>
</compile_context>

<pallas_src>
import functools

import jax
import jax.numpy as jnp
from jax.experimental import pallas as pl
from jax.experimental.pallas import tpu as pltpu


def _round_up(x, m):
    return (x + m - 1) // m * m


# ----------------------------- tiled linear (+bias, +GELU) -----------------------------

def _linear_kernel(x_ref, w_ref, b_ref, o_ref, acc_ref, *, activation):
    @pl.when(pl.program_id(2) == 0)
    def _():
        acc_ref[...] = jnp.zeros_like(acc_ref)

    acc_ref[...] += jnp.dot(x_ref[...], w_ref[...],
                            preferred_element_type=jnp.float32)

    @pl.when(pl.program_id(2) == pl.num_programs(2) - 1)
    def _():
        acc = acc_ref[...] + b_ref[...].astype(jnp.float32)
        if activation == "gelu":
            # exact (erf-based) GELU, same as torch.nn.GELU default
            acc = 0.5 * acc * (1.0 + jax.lax.erf(acc * 0.7071067811865476))
        o_ref[...] = acc.astype(o_ref.dtype)


def pallas_linear(x, w, b=None, activation=None):
    """x: (M, K), w: (K, N), b: (N,) or None -> (M, N).  f32 accumulation."""
    M, K = x.shape
    N = w.shape[1]

    # Tile plan: large enough (>=128) for roofline, small enough for v7x VMEM.
    tm = min(256, _round_up(M, 8))
    tn = min(256, _round_up(N, 128))
    tk = min(512, _round_up(K, 128))
    Mp, Kp, Np = _round_up(M, tm), _round_up(K, tk), _round_up(N, tn)

    xp = x if (Mp == M and Kp == K) else jnp.pad(x, ((0, Mp - M), (0, Kp - K)))
    wp = w if (Kp == K and Np == N) else jnp.pad(w, ((0, Kp - K), (0, Np - N)))
    bias = jnp.zeros((N,), x.dtype) if b is None else b
    bp = (bias if Np == N else jnp.pad(bias, (0, Np - N))).reshape(1, Np)

    grid = (Mp // tm, Np // tn, Kp // tk)
    out = pl.pallas_call(
        functools.partial(_linear_kernel, activation=activation),
        out_shape=jax.ShapeDtypeStruct((Mp, Np), x.dtype),
        grid=grid,
        in_specs=[
            pl.BlockSpec((tm, tk), lambda i, j, k: (i, k)),
            pl.BlockSpec((tk, tn), lambda i, j, k: (k, j)),
            pl.BlockSpec((1, tn), lambda i, j, k: (0, j)),
        ],
        out_specs=pl.BlockSpec((tm, tn), lambda i, j, k: (i, j)),
        scratch_shapes=[pltpu.VMEM((tm, tn), jnp.float32)],
        compiler_params=pltpu.CompilerParams(
            dimension_semantics=("parallel", "parallel", "arbitrary")),
        cost_estimate=pl.CostEstimate(
            flops=2 * Mp * Np * Kp,
            transcendentals=(Mp * Np if activation == "gelu" else 0),
            bytes_accessed=4 * (Mp * Kp + Kp * Np + Mp * Np)),
    )(xp, wp, bp)
    return out[:M, :N] if (Mp != M or Np != N) else out


# ----------------------------- fused residual-add + LayerNorm -----------------------------

def _add_layernorm_kernel(a_ref, b_ref, g_ref, be_ref, o_ref):
    x = a_ref[...].astype(jnp.float32) + b_ref[...].astype(jnp.float32)
    mean = jnp.mean(x, axis=-1, keepdims=True)
    var = jnp.mean((x - mean) ** 2, axis=-1, keepdims=True)
    inv = jax.lax.rsqrt(var + 1e-5)
    o_ref[...] = ((x - mean) * inv * g_ref[...] + be_ref[...]).astype(o_ref.dtype)


def pallas_add_layernorm(a, b, gamma, beta):
    """LayerNorm(a + b) over the last dim (eps=1e-5, affine).  a, b: (M, D)."""
    M, D = a.shape
    tm = min(256, _round_up(M, 8))
    Mp = _round_up(M, tm)
    ap = a if Mp == M else jnp.pad(a, ((0, Mp - M), (0, 0)))
    bp = b if Mp == M else jnp.pad(b, ((0, Mp - M), (0, 0)))
    g = gamma.reshape(1, D)
    be = beta.reshape(1, D)
    out = pl.pallas_call(
        _add_layernorm_kernel,
        out_shape=jax.ShapeDtypeStruct((Mp, D), a.dtype),
        grid=(Mp // tm,),
        in_specs=[
            pl.BlockSpec((tm, D), lambda i: (i, 0)),
            pl.BlockSpec((tm, D), lambda i: (i, 0)),
            pl.BlockSpec((1, D), lambda i: (0, 0)),
            pl.BlockSpec((1, D), lambda i: (0, 0)),
        ],
        out_specs=pl.BlockSpec((tm, D), lambda i: (i, 0)),
        compiler_params=pltpu.CompilerParams(dimension_semantics=("parallel",)),
    )(ap, bp, g, be)
    return out[:M] if Mp != M else out


# ----------------------------- multi-head self-attention -----------------------------

def _mhsa_kernel(qkv_ref, o_ref, *, heads, dh, scale):
    # qkv block: (1, T, 3*heads*dh), packed [Q | K | V], head-major inside each chunk.
    x = qkv_ref[0].astype(jnp.float32)            # (T, 3*HD)
    hd = heads * dh
    q_all = x[:, 0 * hd:1 * hd]
    k_all = x[:, 1 * hd:2 * hd]
    v_all = x[:, 2 * hd:3 * hd]

    outs = []
    for h in range(heads):                        # unrolled; heads is small
        lo, hi = h * dh, (h + 1) * dh
        qh, kh, vh = q_all[:, lo:hi], k_all[:, lo:hi], v_all[:, lo:hi]
        # QK^T: contract the last dims of q and k (no explicit k.T transpose).
        s = jax.lax.dot_general(qh, kh, (((1,), (1,)), ((), ())),
                                preferred_element_type=jnp.float32) * scale
        s = s - jnp.max(s, axis=-1, keepdims=True)
        e = jnp.exp(s)
        p = e * pl.reciprocal(jnp.sum(e, axis=-1, keepdims=True), approx=True)
        outs.append(jnp.dot(p, vh, preferred_element_type=jnp.float32))
    # Single lane-dense store, already in 'b t (h d)' layout.
    o_ref[0] = jnp.concatenate(outs, axis=-1).astype(o_ref.dtype)


def pallas_mhsa(qkv, heads, dh, scale):
    """qkv: (B, T, 3*heads*dh) packed [Q|K|V] -> (B, T, heads*dh).  mask is None in ViT.forward."""
    B, T, three_hd = qkv.shape
    hd = heads * dh
    return pl.pallas_call(
        functools.partial(_mhsa_kernel, heads=heads, dh=dh, scale=scale),
        out_shape=jax.ShapeDtypeStruct((B, T, hd), qkv.dtype),
        grid=(B,),
        in_specs=[pl.BlockSpec((1, T, three_hd), lambda i: (i, 0, 0))],
        out_specs=pl.BlockSpec((1, T, hd), lambda i: (i, 0, 0)),
        compiler_params=pltpu.CompilerParams(dimension_semantics=("parallel",)),
    )(qkv)


# ----------------------------- model assembly -----------------------------

def init_params(key, cfg):
    dim = cfg["dim"]
    heads = cfg["heads"]
    dh = cfg["dim_head"]
    _dim = heads * dh
    dff = cfg["dim_ff"]
    tokens = (cfg["img_dim"] // cfg["patch"]) ** 2
    token_dim = cfg["in_channels"] * cfg["patch"] ** 2

    keys = iter(jax.random.split(key, 64))

    def nrm(shape, scale=0.02):
        return scale * jax.random.normal(next(keys), shape, jnp.float32)

    params = {
        "proj_w": nrm((token_dim, dim)),
        "proj_b": nrm((dim,)),
        "cls": nrm((1, 1, dim), scale=1.0),
        "pos": nrm((tokens + 1, dim), scale=1.0),
        "head_w": nrm((dim, cfg["num_classes"])),
        "head_b": nrm((cfg["num_classes"],)),
        "blocks": [],
    }
    for _ in range(cfg["blocks"]):
        params["blocks"].append({
            # wqkv packed as [Wq | Wk | Wv], head-major inside each chunk.
            # (Loading real PyTorch weights with the 'b t (d k h)' packing would
            # require a column permutation of this matrix.)
            "wqkv": nrm((dim, 3 * _dim)),         # no bias (nn.Linear(..., bias=False))
            "w0": nrm((_dim, dim)),               # no bias
            "ln1_g": jnp.ones((dim,), jnp.float32) + nrm((dim,)),
            "ln1_b": nrm((dim,)),
            "w1": nrm((dim, dff)),
            "b1": nrm((dff,)),
            "w2": nrm((dff, dim)),
            "b2": nrm((dim,)),
            "ln2_g": jnp.ones((dim,), jnp.float32) + nrm((dim,)),
            "ln2_b": nrm((dim,)),
        })
    return params


def _patchify(img, p):
    # einops: 'b c (patch_x x) (patch_y y) -> b (x y) (patch_x patch_y c)'
    B, C, H, W = img.shape
    nx, ny = H // p, W // p
    x = img.reshape(B, C, p, nx, p, ny)          # (b, c, patch_x, x, patch_y, y)
    x = x.transpose(0, 3, 5, 2, 4, 1)            # (b, x, y, patch_x, patch_y, c)
    return x.reshape(B, nx * ny, p * p * C)


def vit_forward(img, params, cfg):
    B, C, H, W = img.shape
    p = cfg["patch"]
    dim = cfg["dim"]
    heads = cfg["heads"]
    dh = cfg["dim_head"]
    hd = heads * dh
    scale = dh ** (-0.5)

    patches = _patchify(img, p)                  # (B, tokens, token_dim)
    tokens = patches.shape[1]
    x = pallas_linear(patches.reshape(B * tokens, -1),
                      params["proj_w"], params["proj_b"]).reshape(B, tokens, dim)

    cls = jnp.broadcast_to(params["cls"], (B, 1, dim))
    x = jnp.concatenate([cls, x], axis=1)                     # (B, T, dim)
    x = x + params["pos"][: tokens + 1]
    T = tokens + 1
    # dropout(p=0) is identity

    for blk in params["blocks"]:
        x2 = x.reshape(B * T, dim)
        # ---- MHSA (postnorm transformer block) ----
        qkv = pallas_linear(x2, blk["wqkv"])                  # (B*T, 3*heads*dh)
        att = pallas_mhsa(qkv.reshape(B, T, 3 * hd), heads, dh, scale)   # (B, T, hd)
        att = pallas_linear(att.reshape(B * T, hd), blk["w0"])           # (B*T, dim)
        y = pallas_add_layernorm(att, x2, blk["ln1_g"], blk["ln1_b"])    # LN(att + x)
        # ---- FFN ----
        h = pallas_linear(y, blk["w1"], blk["b1"], activation="gelu")
        h = pallas_linear(h, blk["w2"], blk["b2"])
        x = pallas_add_layernorm(h, y, blk["ln2_g"], blk["ln2_b"]).reshape(B, T, dim)

    cls_out = x[:, 0, :]                                      # (B, dim)
    return pallas_linear(cls_out, params["head_w"], params["head_b"])


# ------------------------- pure-JAX reference (check) -------------------------

def _ref_ln(x, g, b):
    m = jnp.mean(x, axis=-1, keepdims=True)
    v = jnp.mean((x - m) ** 2, axis=-1, keepdims=True)
    return (x - m) * jax.lax.rsqrt(v + 1e-5) * g + b


def vit_reference(img, params, cfg):
    B, C, H, W = img.shape
    p, dim, heads, dh = cfg["patch"], cfg["dim"], cfg["heads"], cfg["dim_head"]
    scale = dh ** (-0.5)
    patches = _patchify(img, p)
    tokens = patches.shape[1]
    x = patches @ params["proj_w"] + params["proj_b"]
    cls = jnp.broadcast_to(params["cls"], (B, 1, dim))
    x = jnp.concatenate([cls, x], axis=1) + params["pos"][: tokens + 1]
    T = tokens + 1
    for blk in params["blocks"]:
        qkv = x @ blk["wqkv"]                                  # (B, T, 3*hd)
        q, k, v = jnp.split(qkv, 3, axis=-1)
        q = q.reshape(B, T, heads, dh).transpose(0, 2, 1, 3)
        k = k.reshape(B, T, heads, dh).transpose(0, 2, 1, 3)
        v = v.reshape(B, T, heads, dh).transpose(0, 2, 1, 3)
        s = jnp.einsum("bhid,bhjd->bhij", q, k) * scale
        a = jax.nn.softmax(s, axis=-1)
        out = jnp.einsum("bhij,bhjd->bhid", a, v)
        out = out.transpose(0, 2, 1, 3).reshape(B, T, heads * dh)
        att = out @ blk["w0"]
        y = _ref_ln(att + x, blk["ln1_g"], blk["ln1_b"])
        h = jax.nn.gelu(y @ blk["w1"] + blk["b1"], approximate=False)
        h = h @ blk["w2"] + blk["b2"]
        x = _ref_ln(h + y, blk["ln2_g"], blk["ln2_b"])
    return x[:, 0, :] @ params["head_w"] + params["head_b"]


# ----------------------------------- main -----------------------------------

if __name__ == "__main__":
    cfg = {
        "img_dim": 16,
        "in_channels": 4,
        "patch": 8,
        "dim": 32,
        "heads": 4,
        "dim_head": 32 // 4,     # default: dim / heads
        "blocks": 2,
        "dim_ff": 64,
        "num_classes": 10,
    }
    B = 2

    key = jax.random.PRNGKey(0)
    k_params, k_img = jax.random.split(key)
    params = init_params(k_params, cfg)
    img = jax.random.normal(k_img, (B, cfg["in_channels"], cfg["img_dim"], cfg["img_dim"]),
                            jnp.float32)

    fwd = jax.jit(lambda im: vit_forward(im, params, cfg))
    out = jax.block_until_ready(fwd(img))

    ref = vit_reference(img, params, cfg)
    assert out.shape == (B, cfg["num_classes"])
    assert jnp.allclose(out, ref, atol=2e-3, rtol=2e-3), (out, ref)

    print("KERNEL_OK")
</pallas_src>

<mosaic_0001>
module attributes {stable_mosaic.version = 11 : i64} {
  func.func @_linear_kernel(%arg0: i32, %arg1: i32, %arg2: i32, %arg3: memref<8x256xf32, #tpu.memory_space<vmem>>, %arg4: memref<256x128xf32, #tpu.memory_space<vmem>>, %arg5: memref<1x128xf32, #tpu.memory_space<vmem>>, %arg6: memref<8x128xf32, #tpu.memory_space<vmem>>, %arg7: memref<8x128xf32, #tpu.memory_space<vmem>>) attributes {dimension_semantics = [#tpu.dimension_semantics<parallel>, #tpu.dimension_semantics<parallel>, #tpu.dimension_semantics<arbitrary>], iteration_bounds = array<i64: 1, 1, 1>, scalar_prefetch = 0 : i64, scratch_operands = 1 : i64, tpu.core_type = #tpu.core_type<tc>, window_params = [{transform_indices = @transform_0, window_bounds = array<i64: 8, 256>}, {transform_indices = @transform_1, window_bounds = array<i64: 256, 128>}, {transform_indices = @transform_2, window_bounds = array<i64: 1, 128>}, {transform_indices = @transform_3, window_bounds = array<i64: 8, 128>}]} {
    %c0_i32 = arith.constant 0 : i32
    %0 = arith.cmpi eq, %arg2, %c0_i32 : i32
    %1 = arith.extui %0 : i1 to i32
    %c0_i32_0 = arith.constant 0 : i32
    %2 = arith.cmpi ne, %1, %c0_i32_0 : i32
    scf.if %2 {
      %cst_10 = arith.constant 0.000000e+00 : f32
      %12 = vector.broadcast %cst_10 : f32 to vector<8x128xf32>
      %c0_11 = arith.constant 0 : index
      %c0_12 = arith.constant 0 : index
      %13 = vector.load %arg7[%c0_11, %c0_12] : memref<8x128xf32, #tpu.memory_space<vmem>>, vector<8x128xf32>
      tpu.vector_store %arg7[%c0_11, %c0_12], %12 {strides = array<i32>} : memref<8x128xf32, #tpu.memory_space<vmem>>, vector<8x128xf32>,
    } else {
    }
    %c0 = arith.constant 0 : index
    %c0_1 = arith.constant 0 : index
    %3 = vector.load %arg7[%c0, %c0_1] : memref<8x128xf32, #tpu.memory_space<vmem>>, vector<8x128xf32>
    %c0_2 = arith.constant 0 : index
    %c0_3 = arith.constant 0 : index
    %4 = vector.load %arg3[%c0_2, %c0_3] : memref<8x256xf32, #tpu.memory_space<vmem>>, vector<8x256xf32>
    %c0_4 = arith.constant 0 : index
    %c0_5 = arith.constant 0 : index
    %5 = vector.load %arg4[%c0_4, %c0_5] : memref<256x128xf32, #tpu.memory_space<vmem>>, vector<256x128xf32>
    %cst = arith.constant dense<0.000000e+00> : vector<8x128xf32>
    %6 = tpu.matmul %4, %5, %cst {dimension_numbers = #tpu.dot_dimension_numbers<[1], [0], [0], [1], [0, 0, 1, 1], [], []>} : vector<8x256xf32>, vector<256x128xf32>, vector<8x128xf32> -> vector<8x128xf32>
    %7 = arith.addf %3, %6 : vector<8x128xf32>
    %c0_6 = arith.constant 0 : index
    %c0_7 = arith.constant 0 : index
    %8 = vector.load %arg7[%c0_6, %c0_7] : memref<8x128xf32, #tpu.memory_space<vmem>>, vector<8x128xf32>
    tpu.vector_store %arg7[%c0_6, %c0_7], %7 {strides = array<i32>} : memref<8x128xf32, #tpu.memory_space<vmem>>, vector<8x128xf32>,
    %c0_i32_8 = arith.constant 0 : i32
    %9 = arith.cmpi eq, %arg2, %c0_i32_8 : i32
    %10 = arith.extui %9 : i1 to i32
    %c0_i32_9 = arith.constant 0 : i32
    %11 = arith.cmpi ne, %10, %c0_i32_9 : i32
    scf.if %11 {
      %c0_10 = arith.constant 0 : index
      %c0_11 = arith.constant 0 : index
      %12 = vector.load %arg7[%c0_10, %c0_11] : memref<8x128xf32, #tpu.memory_space<vmem>>, vector<8x128xf32>
      %c0_12 = arith.constant 0 : index
      %c0_13 = arith.constant 0 : index
      %13 = vector.load %arg5[%c0_12, %c0_13] : memref<1x128xf32, #tpu.memory_space<vmem>>, vector<1x128xf32>
      %14 = vector.broadcast %13 : vector<1x128xf32> to vector<8x128xf32>
      %15 = arith.addf %12, %14 : vector<8x128xf32>
      %c0_14 = arith.constant 0 : index
      %c0_15 = arith.constant 0 : index
      %16 = vector.load %arg6[%c0_14, %c0_15] : memref<8x128xf32, #tpu.memory_space<vmem>>, vector<8x128xf32>
      tpu.vector_store %arg6[%c0_14, %c0_15], %15 {strides = array<i32>} : memref<8x128xf32, #tpu.memory_space<vmem>>, vector<8x128xf32>,
    } else {
    }
    return
  }
  func.func @transform_0(%arg0: i32, %arg1: i32, %arg2: i32) -> (i32, i32) {
    %c0_i32 = arith.constant 0 : i32
    return %arg0, %arg2 : i32, i32
  }
  func.func @transform_1(%arg0: i32, %arg1: i32, %arg2: i32) -> (i32, i32) {
    %c0_i32 = arith.constant 0 : i32
    return %arg2, %arg1 : i32, i32
  }
  func.func @transform_2(%arg0: i32, %arg1: i32, %arg2: i32) -> (i32, i32) {
    %c0_i32 = arith.constant 0 : i32
    %c0_i32_0 = arith.constant 0 : i32
    return %c0_i32, %arg1 : i32, i32
  }
  func.func @transform_3(%arg0: i32, %arg1: i32, %arg2: i32) -> (i32, i32) {
    %c0_i32 = arith.constant 0 : i32
    return %arg0, %arg1 : i32, i32
  }
}

module attributes {stable_mosaic.version = 11 : i64} {
  func.func @_linear_kernel(%arg0: i32, %arg1: i32, %arg2: i32, %arg3: memref<16x128xf32, #tpu.memory_space<vmem>>, %arg4: memref<128x128xf32, #tpu.memory_space<vmem>>, %arg5: memref<1x128xf32, #tpu.memory_space<vmem>>, %arg6: memref<16x128xf32, #tpu.memory_space<vmem>>, %arg7: memref<16x128xf32, #tpu.memory_space<vmem>>) attributes {dimension_semantics = [#tpu.dimension_semantics<parallel>, #tpu.dimension_semantics<parallel>, #tpu.dimension_semantics<arbitrary>], iteration_bounds = array<i64: 1, 1, 1>, scalar_prefetch = 0 : i64, scratch_operands = 1 : i64, tpu.core_type = #tpu.core_type<tc>, window_params = [{transform_indices = @transform_0, window_bounds = array<i64: 16, 128>}, {transform_indices = @transform_1, window_bounds = array<i64: 128, 128>}, {transform_indices = @transform_2, window_bounds = array<i64: 1, 128>}, {transform_indices = @transform_3, window_bounds = array<i64: 16, 128>}]} {
    %c0_i32 = arith.constant 0 : i32
    %0 = arith.cmpi eq, %arg2, %c0_i32 : i32
    %1 = arith.extui %0 : i1 to i32
    %c0_i32_0 = arith.constant 0 : i32
    %2 = arith.cmpi ne, %1, %c0_i32_0 : i32
    scf.if %2 {
      %cst_10 = arith.constant 0.000000e+00 : f32
      %12 = vector.broadcast %cst_10 : f32 to vector<16x128xf32>
      %c0_11 = arith.constant 0 : index
      %c0_12 = arith.constant 0 : index
      %13 = vector.load %arg7[%c0_11, %c0_12] : memref<16x128xf32, #tpu.memory_space<vmem>>, vector<16x128xf32>
      tpu.vector_store %arg7[%c0_11, %c0_12], %12 {strides = array<i32>} : memref<16x128xf32, #tpu.memory_space<vmem>>, vector<16x128xf32>,
    } else {
    }
    %c0 = arith.constant 0 : index
    %c0_1 = arith.constant 0 : index
    %3 = vector.load %arg7[%c0, %c0_1] : memref<16x128xf32, #tpu.memory_space<vmem>>, vector<16x128xf32>
    %c0_2 = arith.constant 0 : index
    %c0_3 = arith.constant 0 : index
    %4 = vector.load %arg3[%c0_2, %c0_3] : memref<16x128xf32, #tpu.memory_space<vmem>>, vector<16x128xf32>
    %c0_4 = arith.constant 0 : index
    %c0_5 = arith.constant 0 : index
    %5 = vector.load %arg4[%c0_4, %c0_5] : memref<128x128xf32, #tpu.memory_space<vmem>>, vector<128x128xf32>
    %cst = arith.constant dense<0.000000e+00> : vector<16x128xf32>
    %6 = tpu.matmul %4, %5, %cst {dimension_numbers = #tpu.dot_dimension_numbers<[1], [0], [0], [1], [0, 0, 1, 1], [], []>} : vector<16x128xf32>, vector<128x128xf32>, vector<16x128xf32> -> vector<16x128xf32>
    %7 = arith.addf %3, %6 : vector<16x128xf32>
    %c0_6 = arith.constant 0 : index
    %c0_7 = arith.constant 0 : index
    %8 = vector.load %arg7[%c0_6, %c0_7] : memref<16x128xf32, #tpu.memory_space<vmem>>, vector<16x128xf32>
    tpu.vector_store %arg7[%c0_6, %c0_7], %7 {strides = array<i32>} : memref<16x128xf32, #tpu.memory_space<vmem>>, vector<16x128xf32>,
    %c0_i32_8 = arith.constant 0 : i32
    %9 = arith.cmpi eq, %arg2, %c0_i32_8 : i32
    %10 = arith.extui %9 : i1 to i32
    %c0_i32_9 = arith.constant 0 : i32
    %11 = arith.cmpi ne, %10, %c0_i32_9 : i32
    scf.if %11 {
      %c0_10 = arith.constant 0 : index
      %c0_11 = arith.constant 0 : index
      %12 = vector.load %arg7[%c0_10, %c0_11] : memref<16x128xf32, #tpu.memory_space<vmem>>, vector<16x128xf32>
      %c0_12 = arith.constant 0 : index
      %c0_13 = arith.constant 0 : index
      %13 = vector.load %arg5[%c0_12, %c0_13] : memref<1x128xf32, #tpu.memory_space<vmem>>, vector<1x128xf32>
      %14 = vector.broadcast %13 : vector<1x128xf32> to vector<16x128xf32>
      %15 = arith.addf %12, %14 : vector<16x128xf32>
      %c0_14 = arith.constant 0 : index
      %c0_15 = arith.constant 0 : index
      %16 = vector.load %arg6[%c0_14, %c0_15] : memref<16x128xf32, #tpu.memory_space<vmem>>, vector<16x128xf32>
      tpu.vector_store %arg6[%c0_14, %c0_15], %15 {strides = array<i32>} : memref<16x128xf32, #tpu.memory_space<vmem>>, vector<16x128xf32>,
    } else {
    }
    return
  }
  func.func @transform_0(%arg0: i32, %arg1: i32, %arg2: i32) -> (i32, i32) {
    %c0_i32 = arith.constant 0 : i32
    return %arg0, %arg2 : i32, i32
  }
  func.func @transform_1(%arg0: i32, %arg1: i32, %arg2: i32) -> (i32, i32) {
    %c0_i32 = arith.constant 0 : i32
    return %arg2, %arg1 : i32, i32
  }
  func.func @transform_2(%arg0: i32, %arg1: i32, %arg2: i32) -> (i32, i32) {
    %c0_i32 = arith.constant 0 : i32
    %c0_i32_0 = arith.constant 0 : i32
    return %c0_i32, %arg1 : i32, i32
  }
  func.func @transform_3(%arg0: i32, %arg1: i32, %arg2: i32) -> (i32, i32) {
    %c0_i32 = arith.constant 0 : i32
    return %arg0, %arg1 : i32, i32
  }
}

module attributes {stable_mosaic.version = 11 : i64} {
  func.func @_mhsa_kernel(%arg0: i32, %arg1: memref<1x5x96xf32, #tpu.memory_space<vmem>>, %arg2: memref<1x5x32xf32, #tpu.memory_space<vmem>>) attributes {dimension_semantics = [#tpu.dimension_semantics<parallel>], iteration_bounds = array<i64: 2>, scalar_prefetch = 0 : i64, scratch_operands = 0 : i64, tpu.core_type = #tpu.core_type<tc>, window_params = [{transform_indices = @transform_0, window_bounds = array<i64: 1, 5, 96>}, {transform_indices = @transform_1, window_bounds = array<i64: 1, 5, 32>}]} {
    %c0 = arith.constant 0 : index
    %c0_0 = arith.constant 0 : index
    %c0_1 = arith.constant 0 : index
    %0 = vector.load %arg1[%c0, %c0_0, %c0_1] : memref<1x5x96xf32, #tpu.memory_space<vmem>>, vector<1x5x96xf32>
    %1 = vector.shape_cast %0 : vector<1x5x96xf32> to vector<5x96xf32>
    %2 = vector.extract_strided_slice %1 {offsets = [0, 0], sizes = [5, 32], strides = [1, 1]} : vector<5x96xf32> to vector<5x32xf32>
    %3 = vector.extract_strided_slice %1 {offsets = [0, 32], sizes = [5, 32], strides = [1, 1]} : vector<5x96xf32> to vector<5x32xf32>
    %4 = vector.extract_strided_slice %1 {offsets = [0, 64], sizes = [5, 32], strides = [1, 1]} : vector<5x96xf32> to vector<5x32xf32>
    %5 = vector.extract_strided_slice %2 {offsets = [0, 0], sizes = [5, 8], strides = [1, 1]} : vector<5x32xf32> to vector<5x8xf32>
    %6 = vector.extract_strided_slice %3 {offsets = [0, 0], sizes = [5, 8], strides = [1, 1]} : vector<5x32xf32> to vector<5x8xf32>
    %7 = vector.extract_strided_slice %4 {offsets = [0, 0], sizes = [5, 8], strides = [1, 1]} : vector<5x32xf32> to vector<5x8xf32>
    %cst = arith.constant dense<0.000000e+00> : vector<5x5xf32>
    %8 = tpu.matmul %5, %6, %cst {dimension_numbers = #tpu.dot_dimension_numbers<[1], [1], [0], [0], [0, 0, 1, 0], [], []>} : vector<5x8xf32>, vector<5x8xf32>, vector<5x5xf32> -> vector<5x5xf32>
    %cst_2 = arith.constant 0.353553385 : f32
    %9 = vector.broadcast %cst_2 : f32 to vector<5x5xf32>
    %10 = arith.mulf %8, %9 : vector<5x5xf32>
    %cst_3 = arith.constant dense<0xFF800000> : vector<5xf32>
    %11 = vector.multi_reduction <maximumf>, %10, %cst_3 [1] : vector<5x5xf32> to vector<5xf32>
    %12 = vector.shape_cast %11 : vector<5xf32> to vector<5x1xf32>
    %13 = vector.broadcast %12 : vector<5x1xf32> to vector<5x5xf32>
    %14 = arith.subf %10, %13 : vector<5x5xf32>
    %15 = math.exp %14 : vector<5x5xf32>
    %cst_4 = arith.constant dense<0.000000e+00> : vector<5xf32>
    %16 = vector.multi_reduction <add>, %15, %cst_4 [1] : vector<5x5xf32> to vector<5xf32>
    %17 = vector.shape_cast %16 : vector<5xf32> to vector<5x1xf32>
    %18 = tpu.reciprocal %17 {approx = true} : vector<5x1xf32> -> vector<5x1xf32>
    %19 = vector.broadcast %18 : vector<5x1xf32> to vector<5x5xf32>
    %20 = arith.mulf %15, %19 : vector<5x5xf32>
    %cst_5 = arith.constant dense<0.000000e+00> : vector<5x8xf32>
    %21 = tpu.matmul %20, %7, %cst_5 {dimension_numbers = #tpu.dot_dimension_numbers<[1], [0], [0], [1], [0, 0, 1, 1], [], []>} : vector<5x5xf32>, vector<5x8xf32>, vector<5x8xf32> -> vector<5x8xf32>
    %22 = vector.extract_strided_slice %2 {offsets = [0, 8], sizes = [5, 8], strides = [1, 1]} : vector<5x32xf32> to vector<5x8xf32>
    %23 = vector.extract_strided_slice %3 {offsets = [0, 8], sizes = [5, 8], strides = [1, 1]} : vector<5x32xf32> to vector<5x8xf32>
    %24 = vector.extract_strided_slice %4 {offsets = [0, 8], sizes = [5, 8], strides = [1, 1]} : vector<5x32xf32> to vector<5x8xf32>
    %cst_6 = arith.constant dense<0.000000e+00> : vector<5x5xf32>
    %25 = tpu.matmul %22, %23, %cst_6 {dimension_numbers = #tpu.dot_dimension_numbers<[1], [1], [0], [0], [0, 0, 1, 0], [], []>} : vector<5x8xf32>, vector<5x8xf32>, vector<5x5xf32> -> vector<5x5xf32>
    %cst_7 = arith.constant 0.353553385 : f32
    %26 = vector.broadcast %cst_7 : f32 to vector<5x5xf32>
    %27 = arith.mulf %25, %26 : vector<5x5xf32>
    %cst_8 = arith.constant dense<0xFF800000> : vector<5xf32>
    %28 = vector.multi_reduction <maximumf>, %27, %cst_8 [1] : vector<5x5xf32> to vector<5xf32>
    %29 = vector.shape_cast %28 : vector<5xf32> to vector<5x1xf32>
    %30 = vector.broadcast %29 : vector<5x1xf32> to vector<5x5xf32>
    %31 = arith.subf %27, %30 : vector<5x5xf32>
    %32 = math.exp %31 : vector<5x5xf32>
    %cst_9 = arith.constant dense<0.000000e+00> : vector<5xf32>
    %33 = vector.multi_reduction <add>, %32, %cst_9 [1] : vector<5x5xf32> to vector<5xf32>
    %34 = vector.shape_cast %33 : vector<5xf32> to vector<5x1xf32>
    %35 = tpu.reciprocal %34 {approx = true} : vector<5x1xf32> -> vector<5x1xf32>
    %36 = vector.broadcast %35 : vector<5x1xf32> to vector<5x5xf32>
    %37 = arith.mulf %32, %36 : vector<5x5xf32>
    %cst_10 = arith.constant dense<0.000000e+00> : vector<5x8xf32>
    %38 = tpu.matmul %37, %24, %cst_10 {dimension_numbers = #tpu.dot_dimension_numbers<[1], [0], [0], [1], [0, 0, 1, 1], [], []>} : vector<5x5xf32>, vector<5x8xf32>, vector<5x8xf32> -> vector<5x8xf32>
    %39 = vector.extract_strided_slice %2 {offsets = [0, 16], sizes = [5, 8], strides = [1, 1]} : vector<5x32xf32> to vector<5x8xf32>
    %40 = vector.extract_strided_slice %3 {offsets = [0, 16], sizes = [5, 8], strides = [1, 1]} : vector<5x32xf32> to vector<5x8xf32>
    %41 = vector.extract_strided_slice %4 {offsets = [0, 16], sizes = [5, 8], strides = [1, 1]} : vector<5x32xf32> to vector<5x8xf32>
    %cst_11 = arith.constant dense<0.000000e+00> : vector<5x5xf32>
    %42 = tpu.matmul %39, %40, %cst_11 {dimension_numbers = #tpu.dot_dimension_numbers<[1], [1], [0], [0], [0, 0, 1, 0], [], []>} : vector<5x8xf32>, vector<5x8xf32>, vector<5x5xf32> -> vector<5x5xf32>
    %cst_12 = arith.constant 0.353553385 : f32
    %43 = vector.broadcast %cst_12 : f32 to vector<5x5xf32>
    %44 = arith.mulf %42, %43 : vector<5x5xf32>
    %cst_13 = arith.constant dense<0xFF800000> : vector<5xf32>
    %45 = vector.multi_reduction <maximumf>, %44, %cst_13 [1] : vector<5x5xf32> to vector<5xf32>
    %46 = vector.shape_cast %45 : vector<5xf32> to vector<5x1xf32>
    %47 = vector.broadcast %46 : vector<5x1xf32> to vector<5x5xf32>
    %48 = arith.subf %44, %47 : vector<5x5xf32>
    %49 = math.exp %48 : vector<5x5xf32>
    %cst_14 = arith.constant dense<0.000000e+00> : vector<5xf32>
    %50 = vector.multi_reduction <add>, %49, %cst_14 [1] : vector<5x5xf32> to vector<5xf32>
    %51 = vector.shape_cast %50 : vector<5xf32> to vector<5x1xf32>
    %52 = tpu.reciprocal %51 {approx = true} : vector<5x1xf32> -> vector<5x1xf32>
    %53 = vector.broadcast %52 : vector<5x1xf32> to vector<5x5xf32>
    %54 = arith.mulf %49, %53 : vector<5x5xf32>
    %cst_15 = arith.constant dense<0.000000e+00> : vector<5x8xf32>
    %55 = tpu.matmul %54, %41, %cst_15 {dimension_numbers = #tpu.dot_dimension_numbers<[1], [0], [0], [1], [0, 0, 1, 1], [], []>} : vector<5x5xf32>, vector<5x8xf32>, vector<5x8xf32> -> vector<5x8xf32>
    %56 = vector.extract_strided_slice %2 {offsets = [0, 24], sizes = [5, 8], strides = [1, 1]} : vector<5x32xf32> to vector<5x8xf32>
    %57 = vector.extract_strided_slice %3 {offsets = [0, 24], sizes = [5, 8], strides = [1, 1]} : vector<5x32xf32> to vector<5x8xf32>
    %58 = vector.extract_strided_slice %4 {offsets = [0, 24], sizes = [5, 8], strides = [1, 1]} : vector<5x32xf32> to vector<5x8xf32>
    %cst_16 = arith.constant dense<0.000000e+00> : vector<5x5xf32>
    %59 = tpu.matmul %56, %57, %cst_16 {dimension_numbers = #tpu.dot_dimension_numbers<[1], [1], [0], [0], [0, 0, 1, 0], [], []>} : vector<5x8xf32>, vector<5x8xf32>, vector<5x5xf32> -> vector<5x5xf32>
    %cst_17 = arith.constant 0.353553385 : f32
    %60 = vector.broadcast %cst_17 : f32 to vector<5x5xf32>
    %61 = arith.mulf %59, %60 : vector<5x5xf32>
    %cst_18 = arith.constant dense<0xFF800000> : vector<5xf32>
    %62 = vector.multi_reduction <maximumf>, %61, %cst_18 [1] : vector<5x5xf32> to vector<5xf32>
    %63 = vector.shape_cast %62 : vector<5xf32> to vector<5x1xf32>
    %64 = vector.broadcast %63 : vector<5x1xf32> to vector<5x5xf32>
    %65 = arith.subf %61, %64 : vector<5x5xf32>
    %66 = math.exp %65 : vector<5x5xf32>
    %cst_19 = arith.constant dense<0.000000e+00> : vector<5xf32>
    %67 = vector.multi_reduction <add>, %66, %cst_19 [1] : vector<5x5xf32> to vector<5xf32>
    %68 = vector.shape_cast %67 : vector<5xf32> to vector<5x1xf32>
    %69 = tpu.reciprocal %68 {approx = true} : vector<5x1xf32> -> vector<5x1xf32>
    %70 = vector.broadcast %69 : vector<5x1xf32> to vector<5x5xf32>
    %71 = arith.mulf %66, %70 : vector<5x5xf32>
    %cst_20 = arith.constant dense<0.000000e+00> : vector<5x8xf32>
    %72 = tpu.matmul %71, %58, %cst_20 {dimension_numbers = #tpu.dot_dimension_numbers<[1], [0], [0], [1], [0, 0, 1, 1], [], []>} : vector<5x5xf32>, vector<5x8xf32>, vector<5x8xf32> -> vector<5x8xf32>
    %73 = tpu.concatenate %21, %38, %55, %72 in 1 : vector<5x8xf32>, vector<5x8xf32>, vector<5x8xf32>, vector<5x8xf32> -> vector<5x32xf32>
    %c0_21 = arith.constant 0 : index
    %c0_22 = arith.constant 0 : index
    %c0_23 = arith.constant 0 : index
    %74 = vector.load %arg2[%c0_21, %c0_22, %c0_23] : memref<1x5x32xf32, #tpu.memory_space<vmem>>, vector<1x5x32xf32>
    %75 = vector.shape_cast %74 : vector<1x5x32xf32> to vector<5x32xf32>
    %76 = vector.shape_cast %73 : vector<5x32xf32> to vector<1x5x32xf32>
    tpu.vector_store %arg2[%c0_21, %c0_22, %c0_23], %76 {strides = array<i32>} : memref<1x5x32xf32, #tpu.memory_space<vmem>>, vector<1x5x32xf32>,
    return
  }
  func.func @transform_0(%arg0: i32) -> (i32, i32, i32) {
    %c0_i32 = arith.constant 0 : i32
    %c0_i32_0 = arith.constant 0 : i32
    %c0_i32_1 = arith.constant 0 : i32
    return %arg0, %c0_i32, %c0_i32_0 : i32, i32, i32
  }
  func.func @transform_1(%arg0: i32) -> (i32, i32, i32) {
    %c0_i32 = arith.constant 0 : i32
    %c0_i32_0 = arith.constant 0 : i32
    %c0_i32_1 = arith.constant 0 : i32
    return %arg0, %c0_i32, %c0_i32_0 : i32, i32, i32
  }
}

module attributes {stable_mosaic.version = 11 : i64} {
  func.func @_add_layernorm_kernel(%arg0: i32, %arg1: memref<16x32xf32, #tpu.memory_space<vmem>>, %arg2: memref<16x32xf32, #tpu.memory_space<vmem>>, %arg3: memref<1x32xf32, #tpu.memory_space<vmem>>, %arg4: memref<1x32xf32, #tpu.memory_space<vmem>>, %arg5: memref<16x32xf32, #tpu.memory_space<vmem>>) attributes {dimension_semantics = [#tpu.dimension_semantics<parallel>], iteration_bounds = array<i64: 1>, scalar_prefetch = 0 : i64, scratch_operands = 0 : i64, tpu.core_type = #tpu.core_type<tc>, window_params = [{transform_indices = @transform_0, window_bounds = array<i64: 16, 32>}, {transform_indices = @transform_1, window_bounds = array<i64: 16, 32>}, {pipeline_mode = #tpu.pipeline_mode<synchronous>, transform_indices = @transform_2, window_bounds = array<i64: 1, 32>}, {pipeline_mode = #tpu.pipeline_mode<synchronous>, transform_indices = @transform_3, window_bounds = array<i64: 1, 32>}, {transform_indices = @transform_4, window_bounds = array<i64: 16, 32>}]} {
    %c0 = arith.constant 0 : index
    %c0_0 = arith.constant 0 : index
    %0 = vector.load %arg1[%c0, %c0_0] : memref<16x32xf32, #tpu.memory_space<vmem>>, vector<16x32xf32>
    %c0_1 = arith.constant 0 : index
    %c0_2 = arith.constant 0 : index
    %1 = vector.load %arg2[%c0_1, %c0_2] : memref<16x32xf32, #tpu.memory_space<vmem>>, vector<16x32xf32>
    %2 = arith.addf %0, %1 : vector<16x32xf32>
    %cst = arith.constant dense<0.000000e+00> : vector<16xf32>
    %3 = vector.multi_reduction <add>, %2, %cst [1] : vector<16x32xf32> to vector<16xf32>
    %4 = vector.shape_cast %3 : vector<16xf32> to vector<16x1xf32>
    %cst_3 = arith.constant 3.200000e+01 : f32
    %5 = vector.broadcast %cst_3 : f32 to vector<16x1xf32>
    %6 = arith.divf %4, %5 : vector<16x1xf32>
    %7 = vector.broadcast %6 : vector<16x1xf32> to vector<16x32xf32>
    %8 = arith.subf %2, %7 : vector<16x32xf32>
    %9 = arith.mulf %8, %8 : vector<16x32xf32>
    %cst_4 = arith.constant dense<0.000000e+00> : vector<16xf32>
    %10 = vector.multi_reduction <add>, %9, %cst_4 [1] : vector<16x32xf32> to vector<16xf32>
    %11 = vector.shape_cast %10 : vector<16xf32> to vector<16x1xf32>
    %cst_5 = arith.constant 3.200000e+01 : f32
    %12 = vector.broadcast %cst_5 : f32 to vector<16x1xf32>
    %13 = arith.divf %11, %12 : vector<16x1xf32>
    %cst_6 = arith.constant 9.99999974E-6 : f32
    %14 = vector.broadcast %cst_6 : f32 to vector<16x1xf32>
    %15 = arith.addf %13, %14 : vector<16x1xf32>
    %16 = math.rsqrt %15 : vector<16x1xf32>
    %17 = vector.broadcast %6 : vector<16x1xf32> to vector<16x32xf32>
    %18 = arith.subf %2, %17 : vector<16x32xf32>
    %19 = vector.broadcast %16 : vector<16x1xf32> to vector<16x32xf32>
    %20 = arith.mulf %18, %19 : vector<16x32xf32>
    %c0_7 = arith.constant 0 : index
    %c0_8 = arith.constant 0 : index
    %21 = vector.load %arg3[%c0_7, %c0_8] : memref<1x32xf32, #tpu.memory_space<vmem>>, vector<1x32xf32>
    %22 = vector.broadcast %21 : vector<1x32xf32> to vector<16x32xf32>
    %23 = arith.mulf %20, %22 : vector<16x32xf32>
    %c0_9 = arith.constant 0 : index
    %c0_10 = arith.constant 0 : index
    %24 = vector.load %arg4[%c0_9, %c0_10] : memref<1x32xf32, #tpu.memory_space<vmem>>, vector<1x32xf32>
    %25 = vector.broadcast %24 : vector<1x32xf32> to vector<16x32xf32>
    %26 = arith.addf %23, %25 : vector<16x32xf32>
    %c0_11 = arith.constant 0 : index
    %c0_12 = arith.constant 0 : index
    %27 = vector.load %arg5[%c0_11, %c0_12] : memref<16x32xf32, #tpu.memory_space<vmem>>, vector<16x32xf32>
    tpu.vector_store %arg5[%c0_11, %c0_12], %26 {strides = array<i32>} : memref<16x32xf32, #tpu.memory_space<vmem>>, vector<16x32xf32>,
    return
  }
  func.func @transform_0(%arg0: i32) -> (i32, i32) {
    %c0_i32 = arith.constant 0 : i32
    %c0_i32_0 = arith.constant 0 : i32
    return %arg0, %c0_i32 : i32, i32
  }
  func.func @transform_1(%arg0: i32) -> (i32, i32) {
    %c0_i32 = arith.constant 0 : i32
    %c0_i32_0 = arith.constant 0 : i32
    return %arg0, %c0_i32 : i32, i32
  }
  func.func @transform_2(%arg0: i32) -> (i32, i32) {
    %c0_i32 = arith.constant 0 : i32
    %c0_i32_0 = arith.constant 0 : i32
    %c0_i32_1 = arith.constant 0 : i32
    return %c0_i32, %c0_i32_0 : i32, i32
  }
  func.func @transform_3(%arg0: i32) -> (i32, i32) {
    %c0_i32 = arith.constant 0 : i32
    %c0_i32_0 = arith.constant 0 : i32
    %c0_i32_1 = arith.constant 0 : i32
    return %c0_i32, %c0_i32_0 : i32, i32
  }
  func.func @transform_4(%arg0: i32) -> (i32, i32) {
    %c0_i32 = arith.constant 0 : i32
    %c0_i32_0 = arith.constant 0 : i32
    return %arg0, %c0_i32 : i32, i32
  }
}

module attributes {stable_mosaic.version = 11 : i64} {
  func.func @_linear_kernel(%arg0: i32, %arg1: i32, %arg2: i32, %arg3: memref<16x128xf32, #tpu.memory_space<vmem>>, %arg4: memref<128x128xf32, #tpu.memory_space<vmem>>, %arg5: memref<1x128xf32, #tpu.memory_space<vmem>>, %arg6: memref<16x128xf32, #tpu.memory_space<vmem>>, %arg7: memref<16x128xf32, #tpu.memory_space<vmem>>) attributes {dimension_semantics = [#tpu.dimension_semantics<parallel>, #tpu.dimension_semantics<parallel>, #tpu.dimension_semantics<arbitrary>], iteration_bounds = array<i64: 1, 1, 1>, scalar_prefetch = 0 : i64, scratch_operands = 1 : i64, tpu.core_type = #tpu.core_type<tc>, window_params = [{transform_indices = @transform_0, window_bounds = array<i64: 16, 128>}, {transform_indices = @transform_1, window_bounds = array<i64: 128, 128>}, {transform_indices = @transform_2, window_bounds = array<i64: 1, 128>}, {transform_indices = @transform_3, window_bounds = array<i64: 16, 128>}]} {
    %c0_i32 = arith.constant 0 : i32
    %0 = arith.cmpi eq, %arg2, %c0_i32 : i32
    %1 = arith.extui %0 : i1 to i32
    %c0_i32_0 = arith.constant 0 : i32
    %2 = arith.cmpi ne, %1, %c0_i32_0 : i32
    scf.if %2 {
      %cst_10 = arith.constant 0.000000e+00 : f32
      %12 = vector.broadcast %cst_10 : f32 to vector<16x128xf32>
      %c0_11 = arith.constant 0 : index
      %c0_12 = arith.constant 0 : index
      %13 = vector.load %arg7[%c0_11, %c0_12] : memref<16x128xf32, #tpu.memory_space<vmem>>, vector<16x128xf32>
      tpu.vector_store %arg7[%c0_11, %c0_12], %12 {strides = array<i32>} : memref<16x128xf32, #tpu.memory_space<vmem>>, vector<16x128xf32>,
    } else {
    }
    %c0 = arith.constant 0 : index
    %c0_1 = arith.constant 0 : index
    %3 = vector.load %arg7[%c0, %c0_1] : memref<16x128xf32, #tpu.memory_space<vmem>>, vector<16x128xf32>
    %c0_2 = arith.constant 0 : index
    %c0_3 = arith.constant 0 : index
    %4 = vector.load %arg3[%c0_2, %c0_3] : memref<16x128xf32, #tpu.memory_space<vmem>>, vector<16x128xf32>
    %c0_4 = arith.constant 0 : index
    %c0_5 = arith.constant 0 : index
    %5 = vector.load %arg4[%c0_4, %c0_5] : memref<128x128xf32, #tpu.memory_space<vmem>>, vector<128x128xf32>
    %cst = arith.constant dense<0.000000e+00> : vector<16x128xf32>
    %6 = tpu.matmul %4, %5, %cst {dimension_numbers = #tpu.dot_dimension_numbers<[1], [0], [0], [1], [0, 0, 1, 1], [], []>} : vector<16x128xf32>, vector<128x128xf32>, vector<16x128xf32> -> vector<16x128xf32>
    %7 = arith.addf %3, %6 : vector<16x128xf32>
    %c0_6 = arith.constant 0 : index
    %c0_7 = arith.constant 0 : index
    %8 = vector.load %arg7[%c0_6, %c0_7] : memref<16x128xf32, #tpu.memory_space<vmem>>, vector<16x128xf32>
    tpu.vector_store %arg7[%c0_6, %c0_7], %7 {strides = array<i32>} : memref<16x128xf32, #tpu.memory_space<vmem>>, vector<16x128xf32>,
    %c0_i32_8 = arith.constant 0 : i32
    %9 = arith.cmpi eq, %arg2, %c0_i32_8 : i32
    %10 = arith.extui %9 : i1 to i32
    %c0_i32_9 = arith.constant 0 : i32
    %11 = arith.cmpi ne, %10, %c0_i32_9 : i32
    scf.if %11 {
      %c0_10 = arith.constant 0 : index
      %c0_11 = arith.constant 0 : index
      %12 = vector.load %arg7[%c0_10, %c0_11] : memref<16x128xf32, #tpu.memory_space<vmem>>, vector<16x128xf32>
      %c0_12 = arith.constant 0 : index
      %c0_13 = arith.constant 0 : index
      %13 = vector.load %arg5[%c0_12, %c0_13] : memref<1x128xf32, #tpu.memory_space<vmem>>, vector<1x128xf32>
      %14 = vector.broadcast %13 : vector<1x128xf32> to vector<16x128xf32>
      %15 = arith.addf %12, %14 : vector<16x128xf32>
      %cst_14 = arith.constant 5.000000e-01 : f32
      %16 = vector.broadcast %cst_14 : f32 to vector<16x128xf32>
      %17 = arith.mulf %16, %15 : vector<16x128xf32>
      %cst_15 = arith.constant 0.707106769 : f32
      %18 = vector.broadcast %cst_15 : f32 to vector<16x128xf32>
      %19 = arith.mulf %15, %18 : vector<16x128xf32>
      %20 = math.erf %19 : vector<16x128xf32>
      %cst_16 = arith.constant 1.000000e+00 : f32
      %21 = vector.broadcast %cst_16 : f32 to vector<16x128xf32>
      %22 = arith.addf %21, %20 : vector<16x128xf32>
      %23 = arith.mulf %17, %22 : vector<16x128xf32>
      %c0_17 = arith.constant 0 : index
      %c0_18 = arith.constant 0 : index
      %24 = vector.load %arg6[%c0_17, %c0_18] : memref<16x128xf32, #tpu.memory_space<vmem>>, vector<16x128xf32>
      tpu.vector_store %arg6[%c0_17, %c0_18], %23 {strides = array<i32>} : memref<16x128xf32, #tpu.memory_space<vmem>>, vector<16x128xf32>,
    } else {
    }
    return
  }
  func.func @transform_0(%arg0: i32, %arg1: i32, %arg2: i32) -> (i32, i32) {
    %c0_i32 = arith.constant 0 : i32
    return %arg0, %arg2 : i32, i32
  }
  func.func @transform_1(%arg0: i32, %arg1: i32, %arg2: i32) -> (i32, i32) {
    %c0_i32 = arith.constant 0 : i32
    return %arg2, %arg1 : i32, i32
  }
  func.func @transform_2(%arg0: i32, %arg1: i32, %arg2: i32) -> (i32, i32) {
    %c0_i32 = arith.constant 0 : i32
    %c0_i32_0 = arith.constant 0 : i32
    return %c0_i32, %arg1 : i32, i32
  }
  func.func @transform_3(%arg0: i32, %arg1: i32, %arg2: i32) -> (i32, i32) {
    %c0_i32 = arith.constant 0 : i32
    return %arg0, %arg1 : i32, i32
  }
}

module attributes {stable_mosaic.version = 11 : i64} {
  func.func @_linear_kernel(%arg0: i32, %arg1: i32, %arg2: i32, %arg3: memref<8x128xf32, #tpu.memory_space<vmem>>, %arg4: memref<128x128xf32, #tpu.memory_space<vmem>>, %arg5: memref<1x128xf32, #tpu.memory_space<vmem>>, %arg6: memref<8x128xf32, #tpu.memory_space<vmem>>, %arg7: memref<8x128xf32, #tpu.memory_space<vmem>>) attributes {dimension_semantics = [#tpu.dimension_semantics<parallel>, #tpu.dimension_semantics<parallel>, #tpu.dimension_semantics<arbitrary>], iteration_bounds = array<i64: 1, 1, 1>, scalar_prefetch = 0 : i64, scratch_operands = 1 : i64, tpu.core_type = #tpu.core_type<tc>, window_params = [{transform_indices = @transform_0, window_bounds = array<i64: 8, 128>}, {transform_indices = @transform_1, window_bounds = array<i64: 128, 128>}, {transform_indices = @transform_2, window_bounds = array<i64: 1, 128>}, {transform_indices = @transform_3, window_bounds = array<i64: 8, 128>}]} {
    %c0_i32 = arith.constant 0 : i32
    %0 = arith.cmpi eq, %arg2, %c0_i32 : i32
    %1 = arith.extui %0 : i1 to i32
    %c0_i32_0 = arith.constant 0 : i32
    %2 = arith.cmpi ne, %1, %c0_i32_0 : i32
    scf.if %2 {
      %cst_10 = arith.constant 0.000000e+00 : f32
      %12 = vector.broadcast %cst_10 : f32 to vector<8x128xf32>
      %c0_11 = arith.constant 0 : index
      %c0_12 = arith.constant 0 : index
      %13 = vector.load %arg7[%c0_11, %c0_12] : memref<8x128xf32, #tpu.memory_space<vmem>>, vector<8x128xf32>
      tpu.vector_store %arg7[%c0_11, %c0_12], %12 {strides = array<i32>} : memref<8x128xf32, #tpu.memory_space<vmem>>, vector<8x128xf32>,
    } else {
    }
    %c0 = arith.constant 0 : index
    %c0_1 = arith.constant 0 : index
    %3 = vector.load %arg7[%c0, %c0_1] : memref<8x128xf32, #tpu.memory_space<vmem>>, vector<8x128xf32>
    %c0_2 = arith.constant 0 : index
    %c0_3 = arith.constant 0 : index
    %4 = vector.load %arg3[%c0_2, %c0_3] : memref<8x128xf32, #tpu.memory_space<vmem>>, vector<8x128xf32>
    %c0_4 = arith.constant 0 : index
    %c0_5 = arith.constant 0 : index
    %5 = vector.load %arg4[%c0_4, %c0_5] : memref<128x128xf32, #tpu.memory_space<vmem>>, vector<128x128xf32>
    %cst = arith.constant dense<0.000000e+00> : vector<8x128xf32>
    %6 = tpu.matmul %4, %5, %cst {dimension_numbers = #tpu.dot_dimension_numbers<[1], [0], [0], [1], [0, 0, 1, 1], [], []>} : vector<8x128xf32>, vector<128x128xf32>, vector<8x128xf32> -> vector<8x128xf32>
    %7 = arith.addf %3, %6 : vector<8x128xf32>
    %c0_6 = arith.constant 0 : index
    %c0_7 = arith.constant 0 : index
    %8 = vector.load %arg7[%c0_6, %c0_7] : memref<8x128xf32, #tpu.memory_space<vmem>>, vector<8x128xf32>
    tpu.vector_store %arg7[%c0_6, %c0_7], %7 {strides = array<i32>} : memref<8x128xf32, #tpu.memory_space<vmem>>, vector<8x128xf32>,
    %c0_i32_8 = arith.constant 0 : i32
    %9 = arith.cmpi eq, %arg2, %c0_i32_8 : i32
    %10 = arith.extui %9 : i1 to i32
    %c0_i32_9 = arith.constant 0 : i32
    %11 = arith.cmpi ne, %10, %c0_i32_9 : i32
    scf.if %11 {
      %c0_10 = arith.constant 0 : index
      %c0_11 = arith.constant 0 : index
      %12 = vector.load %arg7[%c0_10, %c0_11] : memref<8x128xf32, #tpu.memory_space<vmem>>, vector<8x128xf32>
      %c0_12 = arith.constant 0 : index
      %c0_13 = arith.constant 0 : index
      %13 = vector.load %arg5[%c0_12, %c0_13] : memref<1x128xf32, #tpu.memory_space<vmem>>, vector<1x128xf32>
      %14 = vector.broadcast %13 : vector<1x128xf32> to vector<8x128xf32>
      %15 = arith.addf %12, %14 : vector<8x128xf32>
      %c0_14 = arith.constant 0 : index
      %c0_15 = arith.constant 0 : index
      %16 = vector.load %arg6[%c0_14, %c0_15] : memref<8x128xf32, #tpu.memory_space<vmem>>, vector<8x128xf32>
      tpu.vector_store %arg6[%c0_14, %c0_15], %15 {strides = array<i32>} : memref<8x128xf32, #tpu.memory_space<vmem>>, vector<8x128xf32>,
    } else {
    }
    return
  }
  func.func @transform_0(%arg0: i32, %arg1: i32, %arg2: i32) -> (i32, i32) {
    %c0_i32 = arith.constant 0 : i32
    return %arg0, %arg2 : i32, i32
  }
  func.func @transform_1(%arg0: i32, %arg1: i32, %arg2: i32) -> (i32, i32) {
    %c0_i32 = arith.constant 0 : i32
    return %arg2, %arg1 : i32, i32
  }
  func.func @transform_2(%arg0: i32, %arg1: i32, %arg2: i32) -> (i32, i32) {
    %c0_i32 = arith.constant 0 : i32
    %c0_i32_0 = arith.constant 0 : i32
    return %c0_i32, %arg1 : i32, i32
  }
  func.func @transform_3(%arg0: i32, %arg1: i32, %arg2: i32) -> (i32, i32) {
    %c0_i32 = arith.constant 0 : i32
    return %arg0, %arg1 : i32, i32
  }
}

</mosaic_0001>

<bundles_post_ra>
// kernel: _lambda_.16
= control target key start
LH: loop header
LB: loop body
LE: loop exit
PB: predicated region body
PF: predicated region fallthrough
CT: control target
= control target key end

     0   :  { %s239_s1 = inlined_call_operand.vmem [shape: f32[256,128], index: 1, kind: input, shape index: {}]   ;;  %s240_s0 = inlined_call_operand.vmem [shape: f32[8,256], index: 0, kind: input, shape index: {}]   ;;  %s241_s2 = inlined_call_operand.vmem [shape: f32[1,128], index: 2, kind: input, shape index: {}]   ;;  %s242_s3 = inlined_call_operand.vmem [shape: f32[8,128], index: 3, kind: output, shape index: {}]  }
   0x1   :  { %v37_v0 = vld [vmem:[%s239_s1 + $0x78] sm:$0xff]  ;;  %v36_v2 = vld [vmem:[%s239_s1 + $0x70] sm:$0xff]  ;;  %v35_v4 = vld [vmem:[%s239_s1 + $0x68] sm:$0xff] }
   0x2   :  { %v53_v1 = vld [vmem:[%s239_s1 + $0xf8] sm:$0xff]  ;;  %54 = vmatpush.msra.mxu0 %v37_v0  ;;  %v52_v3 = vld [vmem:[%s239_s1 + $0xf0] sm:$0xff]  ;;  %v51_v5 = vld [vmem:[%s239_s1 + $0xe8] sm:$0xff] }
   0x3   :  { %74 = vmatpush.msra.mxu1 %v53_v1  ;;  %v34_v6 = vld [vmem:[%s239_s1 + $0x60] sm:$0xff]  ;;  %v33_v8 = vld [vmem:[%s239_s1 + $0x58] sm:$0xff]  ;;  %v32_v10 = vld [vmem:[%s239_s1 + $0x50] sm:$0xff] }
   0x4   :  { %55 = vmatpush.msra.mxu0 %v36_v2  ;;  %v50_v7 = vld [vmem:[%s239_s1 + $0xe0] sm:$0xff]  ;;  %v49_v9 = vld [vmem:[%s239_s1 + $0xd8] sm:$0xff]  ;;  %v48_v11 = vld [vmem:[%s239_s1 + $0xd0] sm:$0xff] }
   0x5   :  { %75 = vmatpush.msra.mxu1 %v52_v3  ;;  %v31_v12 = vld [vmem:[%s239_s1 + $0x48] sm:$0xff]  ;;  %v30_v14 = vld [vmem:[%s239_s1 + $0x40] sm:$0xff]  ;;  %v29_v16 = vld [vmem:[%s239_s1 + $0x38] sm:$0xff] }
   0x6   :  { %56 = vmatpush.msra.mxu0 %v35_v4  ;;  %v47_v13 = vld [vmem:[%s239_s1 + $0xc8] sm:$0xff]  ;;  %v46_v15 = vld [vmem:[%s239_s1 + $0xc0] sm:$0xff]  ;;  %v45_v17 = vld [vmem:[%s239_s1 + $0xb8] sm:$0xff] }
   0x7   :  { %76 = vmatpush.msra.mxu1 %v51_v5  ;;  %v28_v18 = vld [vmem:[%s239_s1 + $0x30] sm:$0xff]  ;;  %v27_v20 = vld [vmem:[%s239_s1 + $0x28] sm:$0xff]  ;;  %v26_v22 = vld [vmem:[%s239_s1 + $0x20] sm:$0xff] }
   0x8   :  { %57 = vmatpush.msra.mxu0 %v34_v6  ;;  %v44_v19 = vld [vmem:[%s239_s1 + $0xb0] sm:$0xff]  ;;  %v43_v21 = vld [vmem:[%s239_s1 + $0xa8] sm:$0xff]  ;;  %v42_v23 = vld [vmem:[%s239_s1 + $0xa0] sm:$0xff] }
   0x9   :  { %77 = vmatpush.msra.mxu1 %v50_v7  ;;  %v25_v24 = vld [vmem:[%s239_s1 + $0x18] sm:$0xff]  ;;  %v24_v26 = vld [vmem:[%s239_s1 + $0x10] sm:$0xff]  ;;  %v23_v28 = vld [vmem:[%s239_s1 + $0x8] sm:$0xff] }
   0xa   :  { %58 = vmatpush.msra.mxu0 %v33_v8  ;;  %v41_v25 = vld [vmem:[%s239_s1 + $0x98] sm:$0xff]  ;;  %v40_v27 = vld [vmem:[%s239_s1 + $0x90] sm:$0xff]  ;;  %v39_v29 = vld [vmem:[%s239_s1 + $0x88] sm:$0xff] }
   0xb   :  { %78 = vmatpush.msra.mxu1 %v49_v9  ;;  %v22_v30 = vld [vmem:[%s239_s1] sm:$0xff]  ;;  %v21_v33 = vld [vmem:[%s240_s0 + $0x8] sm:$0xff] }
   0xc   :  { %59 = vmatpush.msra.mxu0 %v32_v10  ;;  %v38_v31 = vld [vmem:[%s239_s1 + $0x80] sm:$0xff] }
   0xd   :  { %79 = vmatpush.msra.mxu1 %v48_v11  ;;  %v20_v32 = vld [vmem:[%s240_s0] sm:$0xff] }
   0xe   :  { %60 = vmatpush.msra.mxu0 %v31_v12  ;;  %v110_v34 = vld [vmem:[%s241_s2] ss:$0 sm:$0xff] }
   0xf   :  { %80 = vmatpush.msra.mxu1 %v47_v13 }
  0x10   :  { %61 = vmatpush.msra.mxu0 %v30_v14 }
  0x11   :  { %81 = vmatpush.msra.mxu1 %v46_v15 }
  0x12   :  { %62 = vmatpush.msra.mxu0 %v29_v16 }
  0x13   :  { %82 = vmatpush.msra.mxu1 %v45_v17 }
  0x14   :  { %63 = vmatpush.msra.mxu0 %v28_v18 }
  0x15   :  { %83 = vmatpush.msra.mxu1 %v44_v19 }
  0x16   :  { %64 = vmatpush.msra.mxu0 %v27_v20 }
  0x17   :  { %84 = vmatpush.msra.mxu1 %v43_v21 }
  0x18   :  { %65 = vmatpush.msra.mxu0 %v26_v22 }
  0x19   :  { %85 = vmatpush.msra.mxu1 %v42_v23 }
  0x1a   :  { %66 = vmatpush.msra.mxu0 %v25_v24 }
  0x1b   :  { %86 = vmatpush.msra.mxu1 %v41_v25 }
  0x1c   :  { %67 = vmatpush.msra.mxu0 %v24_v26 }
  0x1d   :  { %87 = vmatpush.msra.mxu1 %v40_v27 }
  0x1e   :  { %68 = vmatpush.msra.mxu0 %v23_v28 }
  0x1f   :  { %88 = vmatpush.msra.mxu1 %v39_v29 }
  0x20   :  { %69 = vmatpush.msra.mxu0 %v22_v30 }
  0x21   :  { %89 = vmatpush.msra.mxu1 %v38_v31  ;;  %70 = vmatmul.f32.vlgmr.msra.gmra.mxu0 %v20_v32 }
  0x22   :  { %90 = vmatmul.f32.vlgmr.msra.gmra.mxu1 %v21_v33 }
  0x9e   :  { %v71_v35 = vpop.f32.mrf.mxu0 }
  0x9f   :  { %v91_v36 = vpop.f32.mrf.mxu1 }
  0xa0   :  { %v92_v37 = vadd.f32 %v91_v36, %v71_v35 }
  0xa2   :  { %v104_v38 = vadd.f32 %v110_v34, %v92_v37 }
  0xa4   :  { %105 = vst [vmem:[%s242_s3] sm:$0xff] %v104_v38 }

// kernel: _lambda_.17
= control target key start
LH: loop header
LB: loop body
LE: loop exit
PB: predicated region body
PF: predicated region fallthrough
CT: control target
= control target key end

     0   :  { %s184_s1 = inlined_call_operand.vmem [shape: f32[128,128], index: 1, kind: input, shape index: {}]   ;;  %s185_s2 = inlined_call_operand.vmem [shape: f32[1,128], index: 2, kind: input, shape index: {}]   ;;  %s186_s0 = inlined_call_operand.vmem [shape: f32[16,128], index: 0, kind: input, shape index: {}]   ;;  %s187_s3 = inlined_call_operand.vmem [shape: f32[16,128], index: 3, kind: output, shape index: {}]  }
   0x1   :  { %v39_v0 = vld [vmem:[%s184_s1 + $0x78] sm:$0xff]  ;;  %v38_v1 = vld [vmem:[%s184_s1 + $0x70] sm:$0xff]  ;;  %v37_v2 = vld [vmem:[%s184_s1 + $0x68] sm:$0xff] }
   0x2   :  { %40 = vmatpush.msra.mxu0 %v39_v0  ;;  %84 = vmatpush.msra.mxu1 %v39_v0  ;;  %v36_v3 = vld [vmem:[%s184_s1 + $0x60] sm:$0xff]  ;;  %v35_v4 = vld [vmem:[%s184_s1 + $0x58] sm:$0xff]  ;;  %v34_v5 = vld [vmem:[%s184_s1 + $0x50] sm:$0xff] }
   0x3   :  { %v33_v6 = vld [vmem:[%s184_s1 + $0x48] sm:$0xff]  ;;  %v32_v7 = vld [vmem:[%s184_s1 + $0x40] sm:$0xff]  ;;  %v31_v8 = vld [vmem:[%s184_s1 + $0x38] sm:$0xff] }
   0x4   :  { %41 = vmatpush.msra.mxu0 %v38_v1  ;;  %85 = vmatpush.msra.mxu1 %v38_v1  ;;  %v30_v9 = vld [vmem:[%s184_s1 + $0x30] sm:$0xff]  ;;  %v29_v10 = vld [vmem:[%s184_s1 + $0x28] sm:$0xff]  ;;  %v28_v11 = vld [vmem:[%s184_s1 + $0x20] sm:$0xff] }
   0x5   :  { %v27_v12 = vld [vmem:[%s184_s1 + $0x18] sm:$0xff]  ;;  %v26_v13 = vld [vmem:[%s184_s1 + $0x10] sm:$0xff]  ;;  %v25_v14 = vld [vmem:[%s184_s1 + $0x8] sm:$0xff] }
   0x6   :  { %42 = vmatpush.msra.mxu0 %v37_v2  ;;  %86 = vmatpush.msra.mxu1 %v37_v2  ;;  %v24_v15 = vld [vmem:[%s184_s1] sm:$0xff]  ;;  %v23_v17 = vld [vmem:[%s186_s0 + $0x8] sm:$0xff] }
   0x7   :  { %v22_v16 = vld [vmem:[%s186_s0] sm:$0xff] }
   0x8   :  { %43 = vmatpush.msra.mxu0 %v36_v3  ;;  %87 = vmatpush.msra.mxu1 %v36_v3  ;;  %v100_v18 = vld [vmem:[%s185_s2] ss:$0 sm:$0xff] }
   0xa   :  { %44 = vmatpush.msra.mxu0 %v35_v4  ;;  %88 = vmatpush.msra.mxu1 %v35_v4 }
   0xc   :  { %45 = vmatpush.msra.mxu0 %v34_v5  ;;  %89 = vmatpush.msra.mxu1 %v34_v5 }
   0xe   :  { %46 = vmatpush.msra.mxu0 %v33_v6  ;;  %90 = vmatpush.msra.mxu1 %v33_v6 }
  0x10   :  { %47 = vmatpush.msra.mxu0 %v32_v7  ;;  %91 = vmatpush.msra.mxu1 %v32_v7 }
  0x12   :  { %48 = vmatpush.msra.mxu0 %v31_v8  ;;  %92 = vmatpush.msra.mxu1 %v31_v8 }
  0x14   :  { %49 = vmatpush.msra.mxu0 %v30_v9  ;;  %93 = vmatpush.msra.mxu1 %v30_v9 }
  0x16   :  { %50 = vmatpush.msra.mxu0 %v29_v10  ;;  %94 = vmatpush.msra.mxu1 %v29_v10 }
  0x18   :  { %51 = vmatpush.msra.mxu0 %v28_v11  ;;  %95 = vmatpush.msra.mxu1 %v28_v11 }
  0x1a   :  { %52 = vmatpush.msra.mxu0 %v27_v12  ;;  %96 = vmatpush.msra.mxu1 %v27_v12 }
  0x1c   :  { %53 = vmatpush.msra.mxu0 %v26_v13  ;;  %97 = vmatpush.msra.mxu1 %v26_v13 }
  0x1e   :  { %54 = vmatpush.msra.mxu0 %v25_v14  ;;  %98 = vmatpush.msra.mxu1 %v25_v14 }
  0x20   :  { %55 = vmatpush.msra.mxu0 %v24_v15  ;;  %99 = vmatpush.msra.mxu1 %v24_v15 }
  0x21   :  { %56 = vmatmul.f32.vlgmr.msra.gmra.mxu0 %v22_v16  ;;  %59 = vmatmul.f32.vlgmr.msra.gmra.mxu1 %v23_v17 }
  0x9e   :  { %v57_v19 = vpop.f32.mrf.mxu0  ;;  %v60_v20 = vpop.f32.mrf.mxu1 }
  0x9f   :  { %v76_v21 = vadd.f32 %v100_v18, %v57_v19  ;;  %v77_v22 = vadd.f32 %v100_v18, %v60_v20 }
  0xa1   :  { %78 = vst [vmem:[%s187_s3] sm:$0xff] %v76_v21 }
  0xa2   :  { %79 = vst [vmem:[%s187_s3 + $0x8] sm:$0xff] %v77_v22 }

// kernel: _lambda_.18
= control target key start
LH: loop header
LB: loop body
LE: loop exit
PB: predicated region body
PF: predicated region fallthrough
CT: control target
= control target key end

     0   :  { %s551_s6 = smov 0   ;;  %s617_s0 = inlined_call_operand.vmem [shape: f32[2,5,96], index: 0, kind: input, shape index: {}]   ;;  %s618_s1 = inlined_call_operand.vmem [shape: f32[2,5,32], index: 1, kind: output, shape index: {}]  }
   0x1 LB: > { %s456_s7 = sadd.s32 4294967295, %s525_s6   ;;  %p460_p0 = scmp.ge.s32.totalorder %s525_s6, 1  ;;  %s525_s6 = sphi %s551_s6, %s11_s6  }
   0x2   : > { %p86_p1 = scmp.lt.s32.totalorder %s525_s6, 3 }
   0x4   : > { %p87_p2 = pnand %p460_p0, %p86_p1 }
   0x5   : > { %p104_p3 = scmp.lt.s32.totalorder (!%p87_p2), %s456_s7, 1  ;;  %s527_s12 = smov (!%p87_p2), 96  }
   0x6   : > { %90 = sbr.rel (%p87_p2) target bundleno = 1174 (0x496), region = 24  ;;  %s528_s13 = smov (!%p87_p2), 88  }
   0x7   : > { %s529_s14 = smov (!%p87_p2), 120   ;;  %s530_s15 = smov (!%p87_p2), 64  }
   0x8   : > { %s531_s16 = smov (!%p87_p2), 80   ;;  %s532_s17 = smov (!%p87_p2), 72  }
   0x9   : > { %s533_s18 = smov (!%p87_p2), 112   ;;  %s534_s19 = smov (!%p87_p2), 104  }
   0xa   : > { %s535_s20 = smov (!%p87_p2), 48   ;;  %s536_s21 = smov (!%p87_p2), 56  }
   0xb   : > { %s620_s7 = smov (!%p104_p3, %s456_s7), 1  ;;  %vm116_vm0 = vcmask 64512   ;;  %vm142_vm1 = vcmask 36864   ;;  %vm160_vm2 = vcmask 1044480   ;;  %vm156_vm3 = vcmask 39936   ;;  %s537_s22 = smov 40  }
   0xc   : > { %s461_s8 = sshll.u32 %s620_s7, 3  ;;  %s538_s23 = smov 24   ;;  %vm397_vm4 = vcmask 130048   ;;  %vm399_vm5 = vcmask 195584   ;;  %vm401_vm6 = vcmask 258048  }
   0xd   : > { %s107_s11 = scalar_lea.vmem %s617_s0, %s461_s8  ;;  %s539_s24 = smov 8  }
   0xe   : > { %v567_v0 = vld [vmem:[%s107_s11] sm:$0x1f]  ;;  %s540_s25 = smov 16   ;;  %s111_s28 = scalar_lea.vmem %s618_s1, %s461_s8 }
   0xf   : > { %114 = vrot.lane.b32.xlu0 %v567_v0, %s527_s12  ;;  %185 = vrot.lane.b32.xlu1 %v567_v0, %s528_s13 }
  0x10   : > { %183 = vrot.lane.b32.xlu2 %v567_v0, %s529_s14 }
  0x18   : > { %154 = vrot.lane.b32.xlu2 %v567_v0, %s530_s15 }
  0x20   : > { %252 = vrot.lane.b32.xlu2 %v567_v0, %s531_s16 }
  0x28   : > { %319 = vrot.lane.b32.xlu2 %v567_v0, %s532_s17 }
  0x30   : > { %250 = vrot.lane.b32.xlu2 %v567_v0, %s533_s18 }
  0x6a   : > { %v184_v3 = vpop.permute.xlu2 %183 }
  0x72   : > { %v155_v10 = vpop.permute.xlu2 %154 }
  0x73   : > { %465 = vmatpush.msk.msra.mxu1 %vm160_vm2, %v155_v10 }
  0x7a   : > { %v253_v15 = vpop.permute.xlu2 %252 }
  0x7b   : > { %471 = vmatpush.xpose.msk.msrb.mxu1 %vm116_vm0, %v253_v15 }
  0x81   : > { %v115_v1 = vpop.permute.xlu0 %114  ;;  %v186_v2 = vpop.permute.xlu1 %185 }
  0x82   : > { %463 = vmatpush.xpose.msk.msra.mxu0 %vm116_vm0, %v115_v1  ;;  %467 = vmatpush.xpose.msk.msra.mxu2 %vm116_vm0, %v186_v2  ;;  %v320_v17 = vpop.permute.xlu2 %319 }
  0x85   : > { %464 = vmatmul.msk.f32.vlgmr.msra.gmra.mxu0 %vm116_vm0, %v567_v0  ;;  %468 = vmatmul.msk.f32.vlgmr.msra.gmra.mxu2 %vm116_vm0, %v184_v3 }
  0x86   : > { %475 = vmatpush.xpose.msk.msrb.mxu0 %vm116_vm0, %v320_v17 }
  0x8a   : > { %v251_v21 = vpop.permute.xlu2 %250 }
 0x102   : > { %v138_v4 = vpop.f32.mrf.mxu0 }
 0x103   : > { %v141_v5 = vmul.f32 0.35355338, %v138_v4 }
 0x105   : > { %v143_v6 = vsel %vm142_vm1, %v141_v5, -inf }
 0x106   : > { %144 = vmax.xlane.f32.xlu0 %v143_v6 }
 0x108   : > { %v208_v13 = vpop.f32.mrf.mxu2 }
 0x109   : > { %v211_v14 = vmul.f32 0.35355338, %v208_v13 }
 0x10b   : > { %v212_v16 = vsel %vm142_vm1, %v211_v14, -inf }
 0x10c   : > { %213 = vmax.xlane.f32.xlu2 %v212_v16 }
 0x179   : > { %v145_v7 = vpop.xlane.xlu0 %144 }
 0x17a   : > { %v146_v8 = vsub.f32 %v141_v5, %v145_v7 }
 0x17c   : > { %v147_v9 = vmul.f32 1.442695, %v146_v8 }
 0x17e   : > { %503 = vpow2.f32 %v147_v9 }
 0x17f   : > { %v214_v24 = vpop.xlane.xlu2 %213 }
 0x180   : > { %v215_v26 = vsub.f32 %v211_v14, %v214_v24 }
 0x182   : > { %v216_v29 = vmul.f32 1.442695, %v215_v26 }
 0x184   : > { %v504_v11 = vpop.eup %503 }
 0x185   : > { %v149_v12 = vsel %vm142_vm1, %v504_v11, 0.0 }
 0x186   : > { %150 = vadd.xlane.f32.xlu1 %v149_v12 }
 0x19f   : > { %317 = vrot.lane.b32.xlu1 %v567_v0, %s534_s19 }
 0x1f9   : > { %v151_v18 = vpop.xlane.xlu1 %150 }
 0x1fa   : > { %505 = vrcp.f32 %v151_v18 }
 0x1fb   : > { %507 = vpow2.f32 %v216_v29 }
 0x200   : > { %v506_v19 = vpop.eup %505 }
 0x201   : > { %v153_v20 = vmul.f32 %v506_v19, %v504_v11  ;;  %v508_v33 = vpop.eup %507 }
 0x202   : > { %v218_v34 = vsel %vm142_vm1, %v508_v33, 0.0 }
 0x203   : > { %466 = vmatmul.msk.f32.vlgmr.msra.gmra.mxu1 %vm156_vm3, %v153_v20 }
 0x20b   : > { %472 = vmatmul.msk.f32.vlgmr.msrb.gmra.mxu1 %vm116_vm0, %v251_v21 }
 0x211   : > { %v318_v22 = vpop.permute.xlu1 %317 }
 0x212   : > { %476 = vmatmul.msk.f32.vlgmr.msrb.gmra.mxu0 %vm116_vm0, %v318_v22 }
 0x280   : > { %v591_v23 = vpop.f32.mrf.mxu1 }
 0x288   : > { %v275_v25 = vpop.f32.mrf.mxu1 }
 0x289   : > { %v278_v27 = vmul.f32 0.35355338, %v275_v25 }
 0x28b   : > { %v279_v28 = vsel %vm142_vm1, %v278_v27, -inf }
 0x28c   : > { %280 = vmax.xlane.f32.xlu1 %v279_v28 }
 0x28f   : > { %v342_v30 = vpop.f32.mrf.mxu0 }
 0x290   : > { %v345_v31 = vmul.f32 0.35355338, %v342_v30 }
 0x292   : > { %v346_v32 = vsel %vm142_vm1, %v345_v31, -inf }
 0x293   : > { %347 = vmax.xlane.f32.xlu0 %v346_v32 }
 0x29b   : > { %219 = vadd.xlane.f32.xlu0 %v218_v34 }
 0x2a5   : > { %290 = vrot.lane.b32.xlu1 %v567_v0, %s535_s20 }
 0x2ff   : > { %v281_v35 = vpop.xlane.xlu1 %280 }
 0x300   : > { %v282_v36 = vsub.f32 %v278_v27, %v281_v35 }
 0x302   : > { %v283_v37 = vmul.f32 1.442695, %v282_v36 }
 0x304   : > { %509 = vpow2.f32 %v283_v37 }
 0x306   : > { %v348_v38 = vpop.xlane.xlu0 %347 }
 0x307   : > { %v349_v39 = vsub.f32 %v345_v31, %v348_v38 }
 0x309   : > { %v350_v40 = vmul.f32 1.442695, %v349_v39 }
 0x30a   : > { %v510_v41 = vpop.eup %509 }
 0x30b   : > { %511 = vpow2.f32 %v350_v40  ;;  %v285_v42 = vsel %vm142_vm1, %v510_v41, 0.0 }
 0x30c   : > { %286 = vadd.xlane.f32.xlu0 %v285_v42 }
 0x30e   : > { %v220_v45 = vpop.xlane.xlu0 %219 }
 0x311   : > { %v512_v43 = vpop.eup %511 }
 0x312   : > { %v352_v44 = vsel %vm142_vm1, %v512_v43, 0.0 }
 0x313   : > { %353 = vadd.xlane.f32.xlu2 %v352_v44 }
 0x317   : > { %v291_v53 = vpop.permute.xlu1 %290 }
 0x320   : > { %223 = vrot.lane.b32.xlu0 %v567_v0, %s536_s21 }
 0x32b   : > { %357 = vrot.lane.b32.xlu2 %v567_v0, %s537_s22 }
 0x37f   : > { %v287_v47 = vpop.xlane.xlu0 %286 }
 0x386   : > { %v354_v46 = vpop.xlane.xlu2 %353 }
 0x387   : > { %513 = vrcp.f32 %v354_v46 }
 0x388   : > { %515 = vrcp.f32 %v220_v45 }
 0x389   : > { %517 = vrcp.f32 %v287_v47 }
 0x38d   : > { %v514_v48 = vpop.eup %513 }
 0x38e   : > { %v358_v49 = vpop.permute.xlu2 %357  ;;  %v356_v50 = vmul.f32 %v514_v48, %v512_v43  ;;  %v516_v51 = vpop.eup %515 }
 0x38f   : > { %477 = vmatpush.msk.msrb.mxu2 %vm160_vm2, %v358_v49  ;;  %v222_v54 = vmul.f32 %v516_v51, %v508_v33  ;;  %v518_v55 = vpop.eup %517 }
 0x390   : > { %478 = vmatmul.msk.f32.vlgmr.msrb.gmra.mxu2 %vm156_vm3, %v356_v50  ;;  %v289_v56 = vmul.f32 %v518_v55, %v510_v41 }
 0x392   : > { %v224_v52 = vpop.permute.xlu0 %223 }
 0x393   : > { %469 = vmatpush.msk.msra.mxu3 %vm160_vm2, %v224_v52 }
 0x394   : > { %470 = vmatmul.msk.f32.vlgmr.msra.gmra.mxu3 %vm156_vm3, %v222_v54 }
 0x395   : > { %473 = vmatpush.msk.msrb.mxu3 %vm160_vm2, %v291_v53 }
 0x39c   : > { %474 = vmatmul.msk.f32.vlgmr.msrb.gmra.mxu3 %vm156_vm3, %v289_v56 }
 0x413   : > { %v381_v57 = vpop.f32.mrf.mxu2 }
 0x414   : > { %393 = vrot.lane.b32.xlu1 %v381_v57, %s538_s23 }
 0x417   : > { %v247_v58 = vpop.f32.mrf.mxu3 }
 0x418   : > { %385 = vrot.lane.b32.xlu0 %v247_v58, %s539_s24 }
 0x41f   : > { %v314_v59 = vpop.f32.mrf.mxu3 }
 0x420   : > { %389 = vrot.lane.b32.xlu0 %v314_v59, %s540_s25 }
 0x486   : > { %v394_v63 = vpop.permute.xlu1 %393 }
 0x48a   : > { %v386_v60 = vpop.permute.xlu0 %385 }
 0x48b   : > { %v396_v61 = vsel %vm116_vm0, %v591_v23, %v386_v60 }
 0x492   : > { %v390_v62 = vpop.permute.xlu0 %389 }
 0x493   : > { %v398_v0 = vsel %vm397_vm4, %v396_v61, %v390_v62 }
 0x494   : > { %v400_v1 = vsel %vm399_vm5, %v398_v0, %v394_v63 }
 0x495   : > { %402 = vst.msk [vmem:[%s111_s28] sm:$0x1f] %vm401_vm6, %v400_v1 }
 0x496 PF: > { %s11_s6 = sadd.s32 1, %s525_s6  }
 0x497   : > { %p8_p4 = scmp.ge.s32.totalorder %s11_s6, 4  }
 0x499   :  { %10 = sbr.rel (!%p8_p4) target bundleno = 1 (0x1), region = 54 }

// kernel: _lambda_.20
= control target key start
LH: loop header
LB: loop body
LE: loop exit
PB: predicated region body
PF: predicated region fallthrough
CT: control target
= control target key end

     0   :  { %vm23_vm0 = vcmask 261120   ;;  %v102_v8 = vmov 32.0   ;;  %s158_s0 = inlined_call_operand.vmem [shape: f32[16,32], index: 0, kind: input, shape index: {}]   ;;  %s159_s1 = inlined_call_operand.vmem [shape: f32[16,32], index: 1, kind: input, shape index: {}]   ;;  %s160_s2 = inlined_call_operand.vmem [shape: f32[1,32], index: 2, kind: input, shape index: {}]   ;;  %s161_s3 = inlined_call_operand.vmem [shape: f32[1,32], index: 3, kind: input, shape index: {}]   ;;  %s162_s4 = inlined_call_operand.vmem [shape: f32[16,32], index: 4, kind: output, shape index: {}]  }
   0x1   :  { %v17_v0 = vld [vmem:[%s158_s0] sm:$0xff]  ;;  %v18_v3 = vld [vmem:[%s158_s0 + $0x8] sm:$0xff]  ;;  %96 = vrcp.f32 %v102_v8 }
   0x2   :  { %v19_v1 = vld [vmem:[%s159_s1] sm:$0xff]  ;;  %v20_v4 = vld [vmem:[%s159_s1 + $0x8] sm:$0xff] }
   0x3   :  { %v21_v2 = vadd.f32 %v19_v1, %v17_v0  ;;  %v22_v6 = vadd.f32 %v20_v4, %v18_v3  ;;  %v94_v39 = vld [vmem:[%s160_s2] ss:$0 sm:$0xff] }
   0x4   :  { %v95_v42 = vld [vmem:[%s161_s3] ss:$0 sm:$0xff] }
   0x5   :  { %v24_v5 = vsel %vm23_vm0, %v21_v2, 0.0  ;;  %v27_v7 = vsel %vm23_vm0, %v22_v6, 0.0 }
   0x6   :  { %25 = vadd.xlane.f32.xlu0 %v24_v5 }
   0x7   :  { %v97_v9 = vpop.eup %96 }
   0x8   :  { %v31_v10 = vmul.f32 32.0, %v97_v9  ;;  %vm35_vm1 = vweird.f32 %v97_v9 }
   0xa   :  { %v32_v11 = vsub.f32 1.0, %v31_v10 }
   0xc   :  { %v33_v12 = vmul.f32 %v97_v9, %v32_v11 }
   0xe   :  { %28 = vadd.xlane.f32.xlu0 %v27_v7  ;;  %v34_v13 = vadd.f32 %v97_v9, %v33_v12 }
  0x10   :  { %v36_v14 = vsel %vm35_vm1, %v97_v9, %v34_v13 }
  0x79   :  { %v26_v15 = vpop.xlane.xlu0 %25 }
  0x7a   :  { %v37_v16 = vmul.f32 %v36_v14, %v26_v15 }
  0x7c   :  { %v39_v17 = vsub.f32 %v21_v2, %v37_v16 }
  0x7e   :  { %v41_v18 = vmul.f32 %v39_v17, %v39_v17 }
  0x80   :  { %v43_v19 = vsel %vm23_vm0, %v41_v18, 0.0 }
  0x81   :  { %44 = vadd.xlane.f32.xlu1 %v43_v19  ;;  %v29_v20 = vpop.xlane.xlu0 %28 }
  0x82   :  { %v38_v21 = vmul.f32 %v36_v14, %v29_v20 }
  0x84   :  { %v40_v22 = vsub.f32 %v22_v6, %v38_v21 }
  0x86   :  { %v42_v23 = vmul.f32 %v40_v22, %v40_v22 }
  0x88   :  { %v46_v24 = vsel %vm23_vm0, %v42_v23, 0.0 }
  0x89   :  { %47 = vadd.xlane.f32.xlu1 %v46_v24 }
  0xf4   :  { %v45_v25 = vpop.xlane.xlu1 %44 }
  0xf5   :  { %v49_v26 = vmul.f32 %v45_v25, %v36_v14 }
  0xf7   :  { %v51_v27 = vadd.f32 1e-05, %v49_v26 }
  0xf9   :  { %98 = vrsqrt.f32 %v51_v27  ;;  %vm59_vm3 = vweird.f32 %v51_v27 }
  0xfc   :  { %v48_v28 = vpop.xlane.xlu1 %47 }
  0xfd   :  { %v50_v29 = vmul.f32 %v48_v28, %v36_v14 }
  0xff   :  { %v99_v30 = vpop.eup %98  ;;  %v52_v31 = vadd.f32 1e-05, %v50_v29 }
 0x100   :  { %v54_v32 = vmul.f32 %v99_v30, %v51_v27  ;;  %vm60_vm2 = vweird.f32 %v99_v30 }
 0x101   :  { %100 = vrsqrt.f32 %v52_v31  ;;  %vm61_vm4 = vmor %vm59_vm3, %vm60_vm2  ;;  %vm69_vm6 = vweird.f32 %v52_v31 }
 0x102   :  { %v55_v33 = vmul.f32 %v99_v30, %v54_v32 }
 0x104   :  { %v56_v34 = vmul.f32 0.5, %v55_v33 }
 0x106   :  { %v57_v35 = vsub.f32 1.5, %v56_v34 }
 0x107   :  { %v101_v36 = vpop.eup %100 }
 0x108   :  { %v58_v37 = vmul.f32 %v99_v30, %v57_v35  ;;  %v64_v38 = vmul.f32 %v101_v36, %v52_v31  ;;  %vm70_vm5 = vweird.f32 %v101_v36 }
 0x109   :  { %vm71_vm7 = vmor %vm69_vm6, %vm70_vm5 }
 0x10a   :  { %v62_v40 = vsel %vm61_vm4, %v99_v30, %v58_v37  ;;  %v65_v41 = vmul.f32 %v101_v36, %v64_v38 }
 0x10b   :  { %v73_v43 = vmul.f32 %v62_v40, %v39_v17 }
 0x10c   :  { %v66_v44 = vmul.f32 0.5, %v65_v41 }
 0x10d   :  { %v79_v45 = vmul.f32 %v94_v39, %v73_v43 }
 0x10e   :  { %v67_v46 = vsub.f32 1.5, %v66_v44 }
 0x10f   :  { %v85_v47 = vadd.f32 %v95_v42, %v79_v45 }
 0x110   :  { %v68_v48 = vmul.f32 %v101_v36, %v67_v46 }
 0x111   :  { %87 = vst.msk [vmem:[%s162_s4] sm:$0xff] %vm23_vm0, %v85_v47 }
 0x112   :  { %v72_v49 = vsel %vm71_vm7, %v101_v36, %v68_v48 }
 0x113   :  { %v74_v50 = vmul.f32 %v72_v49, %v40_v22 }
 0x115   :  { %v80_v51 = vmul.f32 %v94_v39, %v74_v50 }
 0x117   :  { %v86_v52 = vadd.f32 %v95_v42, %v80_v51 }
 0x119   :  { %88 = vst.msk [vmem:[%s162_s4 + $0x8] sm:$0xff] %vm23_vm0, %v86_v52 }

// kernel: _lambda_.21
= control target key start
LH: loop header
LB: loop body
LE: loop exit
PB: predicated region body
PF: predicated region fallthrough
CT: control target
= control target key end

     0   :  { %s296_s1 = inlined_call_operand.vmem [shape: f32[128,128], index: 1, kind: input, shape index: {}]   ;;  %s297_s2 = inlined_call_operand.vmem [shape: f32[1,128], index: 2, kind: input, shape index: {}]   ;;  %s298_s0 = inlined_call_operand.vmem [shape: f32[16,128], index: 0, kind: input, shape index: {}]   ;;  %s299_s3 = inlined_call_operand.vmem [shape: f32[16,128], index: 3, kind: output, shape index: {}]  }
   0x1   :  { %v39_v0 = vld [vmem:[%s296_s1 + $0x78] sm:$0xff]  ;;  %v38_v1 = vld [vmem:[%s296_s1 + $0x70] sm:$0xff]  ;;  %v37_v2 = vld [vmem:[%s296_s1 + $0x68] sm:$0xff] }
   0x2   :  { %40 = vmatpush.msra.mxu0 %v39_v0  ;;  %174 = vmatpush.msra.mxu1 %v39_v0  ;;  %v36_v3 = vld [vmem:[%s296_s1 + $0x60] sm:$0xff]  ;;  %v35_v4 = vld [vmem:[%s296_s1 + $0x58] sm:$0xff]  ;;  %v34_v5 = vld [vmem:[%s296_s1 + $0x50] sm:$0xff] }
   0x3   :  { %v33_v6 = vld [vmem:[%s296_s1 + $0x48] sm:$0xff]  ;;  %v32_v7 = vld [vmem:[%s296_s1 + $0x40] sm:$0xff]  ;;  %v31_v8 = vld [vmem:[%s296_s1 + $0x38] sm:$0xff] }
   0x4   :  { %41 = vmatpush.msra.mxu0 %v38_v1  ;;  %175 = vmatpush.msra.mxu1 %v38_v1  ;;  %v30_v9 = vld [vmem:[%s296_s1 + $0x30] sm:$0xff]  ;;  %v29_v10 = vld [vmem:[%s296_s1 + $0x28] sm:$0xff]  ;;  %v28_v11 = vld [vmem:[%s296_s1 + $0x20] sm:$0xff] }
   0x5   :  { %v27_v12 = vld [vmem:[%s296_s1 + $0x18] sm:$0xff]  ;;  %v26_v13 = vld [vmem:[%s296_s1 + $0x10] sm:$0xff]  ;;  %v25_v14 = vld [vmem:[%s296_s1 + $0x8] sm:$0xff] }
   0x6   :  { %42 = vmatpush.msra.mxu0 %v37_v2  ;;  %176 = vmatpush.msra.mxu1 %v37_v2  ;;  %v24_v15 = vld [vmem:[%s296_s1] sm:$0xff]  ;;  %v23_v17 = vld [vmem:[%s298_s0 + $0x8] sm:$0xff] }
   0x7   :  { %v22_v16 = vld [vmem:[%s298_s0] sm:$0xff] }
   0x8   :  { %43 = vmatpush.msra.mxu0 %v36_v3  ;;  %177 = vmatpush.msra.mxu1 %v36_v3  ;;  %v190_v18 = vld [vmem:[%s297_s2] ss:$0 sm:$0xff] }
   0xa   :  { %44 = vmatpush.msra.mxu0 %v35_v4  ;;  %178 = vmatpush.msra.mxu1 %v35_v4 }
   0xc   :  { %45 = vmatpush.msra.mxu0 %v34_v5  ;;  %179 = vmatpush.msra.mxu1 %v34_v5 }
   0xe   :  { %46 = vmatpush.msra.mxu0 %v33_v6  ;;  %180 = vmatpush.msra.mxu1 %v33_v6 }
  0x10   :  { %47 = vmatpush.msra.mxu0 %v32_v7  ;;  %181 = vmatpush.msra.mxu1 %v32_v7 }
  0x12   :  { %48 = vmatpush.msra.mxu0 %v31_v8  ;;  %182 = vmatpush.msra.mxu1 %v31_v8 }
  0x14   :  { %49 = vmatpush.msra.mxu0 %v30_v9  ;;  %183 = vmatpush.msra.mxu1 %v30_v9 }
  0x16   :  { %50 = vmatpush.msra.mxu0 %v29_v10  ;;  %184 = vmatpush.msra.mxu1 %v29_v10 }
  0x18   :  { %51 = vmatpush.msra.mxu0 %v28_v11  ;;  %185 = vmatpush.msra.mxu1 %v28_v11 }
  0x1a   :  { %52 = vmatpush.msra.mxu0 %v27_v12  ;;  %186 = vmatpush.msra.mxu1 %v27_v12 }
  0x1c   :  { %53 = vmatpush.msra.mxu0 %v26_v13  ;;  %187 = vmatpush.msra.mxu1 %v26_v13 }
  0x1e   :  { %54 = vmatpush.msra.mxu0 %v25_v14  ;;  %188 = vmatpush.msra.mxu1 %v25_v14 }
  0x20   :  { %55 = vmatpush.msra.mxu0 %v24_v15  ;;  %189 = vmatpush.msra.mxu1 %v24_v15 }
  0x21   :  { %56 = vmatmul.f32.vlgmr.msra.gmra.mxu0 %v22_v16  ;;  %59 = vmatmul.f32.vlgmr.msra.gmra.mxu1 %v23_v17 }
  0x9e   :  { %v57_v19 = vpop.f32.mrf.mxu0  ;;  %v60_v20 = vpop.f32.mrf.mxu1 }
  0x9f   :  { %v272_v21 = vadd.f32 %v190_v18, %v57_v19  ;;  %v274_v22 = vadd.f32 %v190_v18, %v60_v20 }
  0xa1   :  { %v277_v23 = vmul.f32 0.70710677, %v272_v21  ;;  %v280_v24 = vmul.f32 0.70710677, %v274_v22 }
  0xa3   :  { %v82_v25 = vmul.f32 %v277_v23, %v277_v23  ;;  %v122_v26 = vmul.f32 %v280_v24, %v280_v24 }
  0xa5   :  { %v83_v27 = vmin.f32 %v82_v25, 16.0  ;;  %v123_v28 = vmin.f32 %v122_v26, 16.0 }
  0xa7   :  { %v84_v29 = vmul.f32 2.1237322e-06, %v83_v27  ;;  %v95_v30 = vmul.f32 3.8918573e-05, %v83_v27  ;;  %v124_v31 = vmul.f32 2.1237322e-06, %v123_v28 }
  0xa8   :  { %v135_v32 = vmul.f32 3.8918573e-05, %v123_v28 }
  0xa9   :  { %v85_v33 = vadd.f32 0.00028619796, %v84_v29  ;;  %v96_v34 = vadd.f32 0.001143296, %v95_v30  ;;  %v125_v35 = vadd.f32 0.00028619796, %v124_v31 }
  0xaa   :  { %v136_v36 = vadd.f32 0.001143296, %v135_v32 }
  0xab   :  { %v86_v37 = vmul.f32 %v85_v33, %v83_v27  ;;  %v97_v38 = vmul.f32 %v96_v34, %v83_v27  ;;  %v126_v39 = vmul.f32 %v125_v35, %v123_v28  ;;  %v78_v35 = vmul.f32 0.5, %v272_v21 }
  0xac   :  { %v137_v40 = vmul.f32 %v136_v36, %v123_v28 }
  0xad   :  { %v87_v41 = vadd.f32 0.0036580483, %v86_v37  ;;  %v98_v42 = vadd.f32 0.014752088, %v97_v38  ;;  %v127_v45 = vadd.f32 0.0036580483, %v126_v39 }
  0xae   :  { %v138_v43 = vadd.f32 0.014752088, %v137_v40  ;;  %v79_v37 = vmul.f32 0.5, %v274_v22 }
  0xaf   :  { %v99_v44 = vmul.f32 %v98_v42, %v83_v27  ;;  %v88_v47 = vmul.f32 %v87_v41, %v83_v27  ;;  %v128_v51 = vmul.f32 %v127_v45, %v123_v28 }
  0xb0   :  { %v139_v46 = vmul.f32 %v138_v43, %v123_v28 }
  0xb1   :  { %v100_v48 = vadd.f32 0.112945676, %v99_v44  ;;  %v89_v53 = vadd.f32 0.05243302, %v88_v47  ;;  %v129_v57 = vadd.f32 0.05243302, %v128_v51 }
  0xb2   :  { %v140_v49 = vadd.f32 0.112945676, %v139_v46 }
  0xb3   :  { %v101_v50 = vmul.f32 %v100_v48, %v83_v27  ;;  %v90_v59 = vmul.f32 %v89_v53, %v83_v27  ;;  %v130_v62 = vmul.f32 %v129_v57, %v123_v28 }
  0xb4   :  { %v141_v52 = vmul.f32 %v140_v49, %v123_v28 }
  0xb5   :  { %v102_v54 = vadd.f32 0.4994258, %v101_v50  ;;  %v91_v63 = vadd.f32 0.18741608, %v90_v59  ;;  %v131_v0 = vadd.f32 0.18741608, %v130_v62 }
  0xb6   :  { %v142_v55 = vadd.f32 0.4994258, %v141_v52 }
  0xb7   :  { %v103_v56 = vmul.f32 %v102_v54, %v83_v27  ;;  %v92_v2 = vmul.f32 %v91_v63, %v83_v27  ;;  %v132_v5 = vmul.f32 %v131_v0, %v123_v28 }
  0xb8   :  { %v143_v58 = vmul.f32 %v142_v55, %v123_v28 }
  0xb9   :  { %v104_v60 = vadd.f32 1.0, %v103_v56  ;;  %v93_v8 = vadd.f32 1.1283791, %v92_v2  ;;  %v133_v14 = vadd.f32 1.1283791, %v132_v5 }
  0xba   :  { %v144_v61 = vadd.f32 1.0, %v143_v58 }
  0xbb   :  { %191 = vrcp.f32 %v104_v60  ;;  %v116_v9 = vand.u32 2147483648, %v104_v60  ;;  %v114_v12 = vand.u32 2147483647, %v104_v60  ;;  %vm110_vm2 = vweird.f32 %v104_v60 }
  0xbc   :  { %193 = vrcp.f32 %v144_v61  ;;  %v156_v13 = vand.u32 2147483648, %v144_v61  ;;  %v154_v16 = vand.u32 2147483647, %v144_v61  ;;  %vm150_vm4 = vweird.f32 %v144_v61 }
  0xbd   :  { %v117_v18 = vor.u32 1.1754944e-38, %v116_v9  ;;  %v94_v20 = vmul.f32 %v93_v8, %v277_v23  ;;  %vm115_vm5 = vcmp.eq.f32.partialorder %v114_v12, 8.507059e+37  ;;  %v134_v28 = vmul.f32 %v133_v14, %v280_v24 }
  0xbe   :  { %v157_v26 = vor.u32 1.1754944e-38, %v156_v13  ;;  %vm155_vm7 = vcmp.eq.f32.partialorder %v154_v16, 8.507059e+37 }
  0xc1   :  { %v192_v1 = vpop.eup %191 }
  0xc2   :  { %v194_v3 = vpop.eup %193  ;;  %v106_v4 = vmul.f32 %v192_v1, %v104_v60  ;;  %vm111_vm0 = vweird.f32 %v192_v1 }
  0xc3   :  { %v146_v6 = vmul.f32 %v194_v3, %v144_v61  ;;  %vm151_vm1 = vweird.f32 %v194_v3  ;;  %vm112_vm3 = vmor %vm110_vm2, %vm111_vm0 }
  0xc4   :  { %v107_v7 = vsub.f32 1.0, %v106_v4  ;;  %vm152_vm6 = vmor %vm150_vm4, %vm151_vm1 }
  0xc5   :  { %v147_v10 = vsub.f32 1.0, %v146_v6 }
  0xc6   :  { %v108_v11 = vmul.f32 %v192_v1, %v107_v7 }
  0xc7   :  { %v148_v15 = vmul.f32 %v194_v3, %v147_v10 }
  0xc8   :  { %v109_v17 = vadd.f32 %v192_v1, %v108_v11 }
  0xc9   :  { %v149_v19 = vadd.f32 %v194_v3, %v148_v15 }
  0xca   :  { %v113_v25 = vsel %vm112_vm3, %v192_v1, %v109_v17 }
  0xcb   :  { %v118_v27 = vsel %vm115_vm5, %v117_v18, %v113_v25  ;;  %v153_v29 = vsel %vm152_vm6, %v194_v3, %v149_v19 }
  0xcc   :  { %v119_v30 = vmul.f32 %v118_v27, %v94_v20  ;;  %v158_v31 = vsel %vm155_vm7, %v157_v26, %v153_v29 }
  0xcd   :  { %v159_v32 = vmul.f32 %v158_v31, %v134_v28 }
  0xce   :  { %v172_v33 = vclamps-f32 %v119_v30, 1.0 }
  0xcf   :  { %v173_v34 = vclamps-f32 %v159_v32, 1.0 }
  0xd0   :  { %v162_v36 = vadd.f32 1.0, %v172_v33 }
  0xd1   :  { %v163_v23 = vadd.f32 1.0, %v173_v34 }
  0xd2   :  { %v164_v38 = vmul.f32 %v162_v36, %v78_v35 }
  0xd3   :  { %v165_v39 = vmul.f32 %v163_v23, %v79_v37 }
  0xd4   :  { %166 = vst [vmem:[%s299_s3] sm:$0xff] %v164_v38 }
  0xd5   :  { %167 = vst [vmem:[%s299_s3 + $0x8] sm:$0xff] %v165_v39 }

// kernel: _lambda_.31
= control target key start
LH: loop header
LB: loop body
LE: loop exit
PB: predicated region body
PF: predicated region fallthrough
CT: control target
= control target key end

     0   :  { %s151_s1 = inlined_call_operand.vmem [shape: f32[128,128], index: 1, kind: input, shape index: {}]   ;;  %s152_s2 = inlined_call_operand.vmem [shape: f32[1,128], index: 2, kind: input, shape index: {}]   ;;  %s153_s0 = inlined_call_operand.vmem [shape: f32[8,128], index: 0, kind: input, shape index: {}]   ;;  %s154_s3 = inlined_call_operand.vmem [shape: f32[8,128], index: 3, kind: output, shape index: {}]  }
   0x1   :  { %v36_v0 = vld [vmem:[%s151_s1 + $0x78] sm:$0xff]  ;;  %v35_v1 = vld [vmem:[%s151_s1 + $0x70] sm:$0xff]  ;;  %v34_v2 = vld [vmem:[%s151_s1 + $0x68] sm:$0xff] }
   0x2   :  { %37 = vmatpush.msra.mxu0 %v36_v0  ;;  %v33_v3 = vld [vmem:[%s151_s1 + $0x60] sm:$0xff]  ;;  %v32_v4 = vld [vmem:[%s151_s1 + $0x58] sm:$0xff]  ;;  %v31_v5 = vld [vmem:[%s151_s1 + $0x50] sm:$0xff] }
   0x3   :  { %v30_v6 = vld [vmem:[%s151_s1 + $0x48] sm:$0xff]  ;;  %v29_v7 = vld [vmem:[%s151_s1 + $0x40] sm:$0xff]  ;;  %v28_v8 = vld [vmem:[%s151_s1 + $0x38] sm:$0xff] }
   0x4   :  { %38 = vmatpush.msra.mxu0 %v35_v1  ;;  %v27_v9 = vld [vmem:[%s151_s1 + $0x30] sm:$0xff]  ;;  %v26_v10 = vld [vmem:[%s151_s1 + $0x28] sm:$0xff]  ;;  %v25_v11 = vld [vmem:[%s151_s1 + $0x20] sm:$0xff] }
   0x5   :  { %v24_v12 = vld [vmem:[%s151_s1 + $0x18] sm:$0xff]  ;;  %v23_v13 = vld [vmem:[%s151_s1 + $0x10] sm:$0xff]  ;;  %v22_v14 = vld [vmem:[%s151_s1 + $0x8] sm:$0xff] }
   0x6   :  { %39 = vmatpush.msra.mxu0 %v34_v2  ;;  %v21_v15 = vld [vmem:[%s151_s1] sm:$0xff] }
   0x7   :  { %v20_v16 = vld [vmem:[%s153_s0] sm:$0xff] }
   0x8   :  { %40 = vmatpush.msra.mxu0 %v33_v3  ;;  %v73_v17 = vld [vmem:[%s152_s2] ss:$0 sm:$0xff] }
   0xa   :  { %41 = vmatpush.msra.mxu0 %v32_v4 }
   0xc   :  { %42 = vmatpush.msra.mxu0 %v31_v5 }
   0xe   :  { %43 = vmatpush.msra.mxu0 %v30_v6 }
  0x10   :  { %44 = vmatpush.msra.mxu0 %v29_v7 }
  0x12   :  { %45 = vmatpush.msra.mxu0 %v28_v8 }
  0x14   :  { %46 = vmatpush.msra.mxu0 %v27_v9 }
  0x16   :  { %47 = vmatpush.msra.mxu0 %v26_v10 }
  0x18   :  { %48 = vmatpush.msra.mxu0 %v25_v11 }
  0x1a   :  { %49 = vmatpush.msra.mxu0 %v24_v12 }
  0x1c   :  { %50 = vmatpush.msra.mxu0 %v23_v13 }
  0x1e   :  { %51 = vmatpush.msra.mxu0 %v22_v14 }
  0x20   :  { %52 = vmatpush.msra.mxu0 %v21_v15 }
  0x21   :  { %53 = vmatmul.f32.vlgmr.msra.gmra.mxu0 %v20_v16 }
  0x9e   :  { %v54_v18 = vpop.f32.mrf.mxu0 }
  0x9f   :  { %v67_v19 = vadd.f32 %v73_v17, %v54_v18 }
  0xa1   :  { %68 = vst [vmem:[%s154_s3] sm:$0xff] %v67_v19 }

</bundles_post_ra>
